<compile_context>
chip_gen: v6e
topology: v6e:2x2x1
jax: 0.10.0
libtpu: 0.0.40
codegen_flags: <defaults>
</compile_context>

<pallas_src>
import numpy as np
import jax
import jax.numpy as jnp
from jax import lax
from jax.experimental import pallas as pl
from jax.experimental.pallas import tpu as pltpu


def _round_up(n, m):
    return ((n + m - 1) // m) * m


def sta_layer_pallas(x, state, params):
    """x: (B, Cin, H, W) NCHW, state: (B, Cs, H, W) NCHW -> (B, Cs, H, W)."""
    B, Cin, H, W = x.shape
    Cs = state.shape[1]
    HW = H * W

    Cin_p = _round_up(Cin, 8)            # channel dims padded to sublane multiple
    Cs_p = _round_up(Cs, 8)
    Cmax = max(Cin_p, 2 * Cs_p)
    PAD = _round_up(W + 1, 128)          # left/right zero halo inside the scratch row
    PADW = HW + 2 * PAD
    f32 = jnp.float32

    # TODO(synk): for large H*W add a spatial grid axis with a +-W-row halo and
    # size the tile for v7x's 64 MiB VMEM (set vmem_limit_bytes explicitly);
    # at these sizes the whole per-batch working set fits comfortably.

    # ---- glue: NCHW -> (B, C, HW) with zero-padded channels (no transpose)
    def feat_in(v, cp):
        b, c = v.shape[0], v.shape[1]
        v = v.reshape(b, c, HW).astype(f32)
        return jnp.pad(v, ((0, 0), (0, cp - c), (0, 0)))

    xf = feat_in(x, Cin_p)               # (B, Cin_p, HW)
    sf = feat_in(state, Cs_p)            # (B, Cs_p,  HW)

    # ---- x-wraparound masks (y / flat boundary handled by the zero halo)
    col = np.arange(HW) % W
    mneg = jnp.asarray((col != 0).astype(np.float32).reshape(1, HW))      # dx = -1
    mpos = jnp.asarray((col != W - 1).astype(np.float32).reshape(1, HW))  # dx = +1

    # ---- weights: tap-major along sublanes, (9*Cout_p, Cin_p); tap k's weight
    #      block is rows [k*Cout_p, (k+1)*Cout_p) (aligned sublane slice).
    def pad_oihw(w, cout_p, cin_p):
        co, ci = w.shape[0], w.shape[1]
        return jnp.pad(w, ((0, cout_p - co), (0, cin_p - ci), (0, 0), (0, 0)))

    def to_tap_major(w4):                # (cout_p, cin_p, 3, 3) -> (9*cout_p, cin_p)
        cout_p, cin_p = w4.shape[0], w4.shape[1]
        return jnp.transpose(w4, (2, 3, 0, 1)).reshape(9 * cout_p, cin_p).astype(f32)

    def bk(b, cout_p):
        return jnp.pad(b, (0, cout_p - b.shape[0])).reshape(cout_p, 1).astype(f32)

    we1 = to_tap_major(pad_oihw(params['emb1'][0], Cs_p, Cin_p))
    be1 = bk(params['emb1'][1], Cs_p)
    we2 = to_tap_major(pad_oihw(params['emb2'][0], Cs_p, Cs_p))
    be2 = bk(params['emb2'][1], Cs_p)

    # diff conv acts on concat(emb1, emb2); the halves live at pad rows
    # [0, Cs_p) and [Cs_p, 2*Cs_p).
    w_diff = params['diff'][0]
    wd4 = jnp.concatenate([pad_oihw(w_diff[:, :Cs], Cs, Cs_p),
                           pad_oihw(w_diff[:, Cs:], Cs, Cs_p)], axis=1)
    wd = to_tap_major(jnp.pad(wd4, ((0, Cs_p - Cs), (0, 0), (0, 0), (0, 0))))
    bd = bk(params['diff'][1], Cs_p)

    # fused STA_scale0 || STA_shift0 (shared RHS = feat): 2*Cs_p output channels
    w01 = to_tap_major(jnp.concatenate(
        [pad_oihw(params['STA_scale0'][0], Cs_p, Cs_p),
         pad_oihw(params['STA_shift0'][0], Cs_p, Cs_p)], axis=0))
    b01 = jnp.concatenate([bk(params['STA_scale0'][1], Cs_p),
                           bk(params['STA_shift0'][1], Cs_p)], axis=0)

    # fused block-diagonal STA_scale1 / STA_shift1 over concat(sc0, sh0)
    wsc1_4 = pad_oihw(params['STA_scale1'][0], Cs_p, 2 * Cs_p)      # in ch [0, Cs)
    wsh1_4 = jnp.pad(params['STA_shift1'][0],                        # in ch [Cs_p, Cs_p+Cs)
                     ((0, Cs_p - Cs), (Cs_p, Cs_p - Cs), (0, 0), (0, 0)))
    wfin = to_tap_major(jnp.concatenate([wsc1_4, wsh1_4], axis=0))   # (9*2Cs_p, 2Cs_p)
    bfin = jnp.concatenate([bk(params['STA_scale1'][1], Cs_p),
                            bk(params['STA_shift1'][1], Cs_p)], axis=0)

    ins = (xf, sf, mneg, mpos, we1, be1, we2, be2, wd, bd, w01, b01, wfin, bfin)

    # ---------------- kernel ----------------
    def kernel(x_ref, s_ref, mneg_ref, mpos_ref,
               we1_ref, be1_ref, we2_ref, be2_ref, wd_ref, bd_ref,
               w01_ref, b01_ref, wfin_ref, bfin_ref,
               out_ref, pad_ref):
        # Invariant: halo lanes [0, PAD) and [PAD+HW, PADW) are zeroed once at
        # grid step 0 and never written again; write_pad only touches
        # [PAD, PAD+HW), and each conv reads only the rows its stage just wrote.
        @pl.when(pl.program_id(0) == 0)
        def _():
            pad_ref[...] = jnp.zeros(pad_ref.shape, pad_ref.dtype)

        mneg_v = mneg_ref[...]           # (1, HW)
        mpos_v = mpos_ref[...]

        def write_pad(f, row0):
            pad_ref[pl.ds(row0, f.shape[0]), pl.ds(PAD, HW)] = f

        def conv(cin, cout, w_ref, b_ref):
            # Stack-free 3x3 conv: 9 accumulating (cout,cin)@(cin,HW) matmuls on
            # lane-shifted views of pad_ref; x-wrap corrected on the output,
            # once per kx group.
            parts = [None, None, None]   # grouped by kx
            for ky in range(3):
                for kx in range(3):
                    k = ky * 3 + kx
                    s = (ky - 1) * W + (kx - 1)
                    rhs = pad_ref[pl.ds(0, cin), pl.ds(PAD + s, HW)]
                    lhs = w_ref[pl.ds(k * cout, cout), :]
                    p = jnp.dot(lhs, rhs, preferred_element_type=jnp.float32)
                    parts[kx] = p if parts[kx] is None else parts[kx] + p
            return parts[0] * mneg_v + parts[1] + parts[2] * mpos_v + b_ref[...]

        def lrelu(v):                    # LeakyReLU(0.1), per the PyTorch module
            return jnp.where(v >= 0, v, 0.1 * v)

        x_v = x_ref[0]                   # (Cin_p, HW)
        s_v = s_ref[0]                   # (Cs_p,  HW)

        write_pad(x_v, 0)
        emb1 = conv(Cin_p, Cs_p, we1_ref, be1_ref)

        write_pad(s_v, 0)
        emb2 = conv(Cs_p, Cs_p, we2_ref, be2_ref)

        write_pad(emb1, 0)
        write_pad(emb2, Cs_p)
        feat = conv(2 * Cs_p, Cs_p, wd_ref, bd_ref)

        write_pad(feat, 0)
        s01 = lrelu(conv(Cs_p, 2 * Cs_p, w01_ref, b01_ref))   # sc0 || sh0

        write_pad(s01, 0)
        sa = conv(2 * Cs_p, 2 * Cs_p, wfin_ref, bfin_ref)     # scale || add

        out_ref[0] = s_v * sa[:Cs_p] + sa[Cs_p:]

    # ---------------- specs ----------------
    def bspec(c):
        return pl.BlockSpec((1, c, HW), lambda b: (b, 0, 0))

    def cspec(a):
        nd = a.ndim
        return pl.BlockSpec(a.shape, lambda b, nd=nd: (0,) * nd)

    # NOTE(perf): the constant weight/bias/mask operands could be single-
    # buffered (pipeline_mode=pl.Buffered(1)); at these sizes the VMEM saving
    # is negligible so they are left at the default.
    in_specs = [bspec(Cin_p), bspec(Cs_p)] + [cspec(a) for a in ins[2:]]

    out = pl.pallas_call(
        kernel,
        out_shape=jax.ShapeDtypeStruct((B, Cs_p, HW), f32),
        grid=(B,),
        in_specs=in_specs,
        out_specs=bspec(Cs_p),
        scratch_shapes=[pltpu.VMEM((Cmax, PADW), f32)],      # zero-halo feature rows
        compiler_params=pltpu.CompilerParams(dimension_semantics=("parallel",)),
    )(*ins)

    # glue: (B, Cs_p, HW) -> NCHW (drop channel padding)
    return out[:, :Cs].reshape(B, Cs, H, W)


def init_params(key, input_feat, state_feat):
    """Deterministic synthetic parameters matching PyTorch Conv2d shapes."""
    names_shapes = [
        ('emb1', (state_feat, input_feat, 3, 3)),
        ('emb2', (state_feat, state_feat, 3, 3)),
        ('diff', (state_feat, 2 * state_feat, 3, 3)),
        ('STA_scale0', (state_feat, state_feat, 3, 3)),
        ('STA_scale1', (state_feat, state_feat, 3, 3)),
        ('STA_shift0', (state_feat, state_feat, 3, 3)),
        ('STA_shift1', (state_feat, state_feat, 3, 3)),
    ]
    params = {}
    for name, shp in names_shapes:
        key, kw, kb = jax.random.split(key, 3)
        params[name] = (0.1 * jax.random.normal(kw, shp, dtype=jnp.float32),
                        0.1 * jax.random.normal(kb, (shp[0],), dtype=jnp.float32))
    return params


def sta_layer_ref(x, state, params):
    """Pure-JAX reference mirroring the PyTorch forward (for verification)."""
    def conv(v, wb):
        w, b = wb
        y = lax.conv_general_dilated(v, w, (1, 1), ((1, 1), (1, 1)),
                                     dimension_numbers=('NCHW', 'OIHW', 'NCHW'),
                                     precision=lax.Precision.HIGHEST)
        return y + b[None, :, None, None]

    lrelu = lambda v: jnp.where(v >= 0, v, 0.1 * v)
    emb1 = conv(x, params['emb1'])
    emb2 = conv(state, params['emb2'])
    feat = conv(jnp.concatenate([emb1, emb2], axis=1), params['diff'])
    scale = conv(lrelu(conv(feat, params['STA_scale0'])), params['STA_scale1'])
    add = conv(lrelu(conv(feat, params['STA_shift0'])), params['STA_shift1'])
    return state * scale + add


if __name__ == "__main__":
    key = jax.random.PRNGKey(0)
    B, Cin, Cs, H, W = 2, 4, 8, 16, 16

    k1, k2, k3 = jax.random.split(key, 3)
    x = jax.random.normal(k1, (B, Cin, H, W), dtype=jnp.float32)
    state = jax.random.normal(k2, (B, Cs, H, W), dtype=jnp.float32)
    params = init_params(k3, Cin, Cs)

    out = sta_layer_pallas(x, state, params)
    out = jax.block_until_ready(out)

    ref = sta_layer_ref(x, state, params)
    err = float(jnp.max(jnp.abs(out - ref)))
    if out.shape != ref.shape or not np.isfinite(err) or err > 5e-2:
        raise AssertionError(f"Pallas/ref mismatch: max abs err = {err}")

    print("KERNEL_OK")
</pallas_src>

<mosaic_0001>
module attributes {stable_mosaic.version = 11 : i64} {
  func.func @kernel(%arg0: i32, %arg1: memref<1x8x256xf32, #tpu.memory_space<vmem>>, %arg2: memref<1x8x256xf32, #tpu.memory_space<vmem>>, %arg3: memref<1x256xf32, #tpu.memory_space<vmem>>, %arg4: memref<1x256xf32, #tpu.memory_space<vmem>>, %arg5: memref<72x8xf32, #tpu.memory_space<vmem>>, %arg6: memref<8x1xf32, #tpu.memory_space<vmem>>, %arg7: memref<72x8xf32, #tpu.memory_space<vmem>>, %arg8: memref<8x1xf32, #tpu.memory_space<vmem>>, %arg9: memref<72x16xf32, #tpu.memory_space<vmem>>, %arg10: memref<8x1xf32, #tpu.memory_space<vmem>>, %arg11: memref<144x8xf32, #tpu.memory_space<vmem>>, %arg12: memref<16x1xf32, #tpu.memory_space<vmem>>, %arg13: memref<144x16xf32, #tpu.memory_space<vmem>>, %arg14: memref<16x1xf32, #tpu.memory_space<vmem>>, %arg15: memref<1x8x256xf32, #tpu.memory_space<vmem>>, %arg16: memref<16x512xf32, #tpu.memory_space<vmem>>) attributes {dimension_semantics = [#tpu.dimension_semantics<parallel>], iteration_bounds = array<i64: 2>, scalar_prefetch = 0 : i64, scratch_operands = 1 : i64, tpu.core_type = #tpu.core_type<tc>, window_params = [{transform_indices = @transform_0, window_bounds = array<i64: 1, 8, 256>}, {transform_indices = @transform_1, window_bounds = array<i64: 1, 8, 256>}, {pipeline_mode = #tpu.pipeline_mode<synchronous>, transform_indices = @transform_2, window_bounds = array<i64: 1, 256>}, {pipeline_mode = #tpu.pipeline_mode<synchronous>, transform_indices = @transform_3, window_bounds = array<i64: 1, 256>}, {pipeline_mode = #tpu.pipeline_mode<synchronous>, transform_indices = @transform_4, window_bounds = array<i64: 72, 8>}, {pipeline_mode = #tpu.pipeline_mode<synchronous>, transform_indices = @transform_5, window_bounds = array<i64: 8, 1>}, {pipeline_mode = #tpu.pipeline_mode<synchronous>, transform_indices = @transform_6, window_bounds = array<i64: 72, 8>}, {pipeline_mode = #tpu.pipeline_mode<synchronous>, transform_indices = @transform_7, window_bounds = array<i64: 8, 1>}, {pipeline_mode = #tpu.pipeline_mode<synchronous>, transform_indices = @transform_8, window_bounds = array<i64: 72, 16>}, {pipeline_mode = #tpu.pipeline_mode<synchronous>, transform_indices = @transform_9, window_bounds = array<i64: 8, 1>}, {pipeline_mode = #tpu.pipeline_mode<synchronous>, transform_indices = @transform_10, window_bounds = array<i64: 144, 8>}, {pipeline_mode = #tpu.pipeline_mode<synchronous>, transform_indices = @transform_11, window_bounds = array<i64: 16, 1>}, {pipeline_mode = #tpu.pipeline_mode<synchronous>, transform_indices = @transform_12, window_bounds = array<i64: 144, 16>}, {pipeline_mode = #tpu.pipeline_mode<synchronous>, transform_indices = @transform_13, window_bounds = array<i64: 16, 1>}, {transform_indices = @transform_14, window_bounds = array<i64: 1, 8, 256>}]} {
    %c0_i32 = arith.constant 0 : i32
    %0 = arith.cmpi eq, %arg0, %c0_i32 : i32
    %1 = arith.extui %0 : i1 to i32
    %c0_i32_0 = arith.constant 0 : i32
    %2 = arith.cmpi ne, %1, %c0_i32_0 : i32
    scf.if %2 {
      %cst_242 = arith.constant 0.000000e+00 : f32
      %237 = vector.broadcast %cst_242 : f32 to vector<16x512xf32>
      %c0_243 = arith.constant 0 : index
      %c0_244 = arith.constant 0 : index
      %238 = vector.load %arg16[%c0_243, %c0_244] : memref<16x512xf32, #tpu.memory_space<vmem>>, vector<16x512xf32>
      tpu.vector_store %arg16[%c0_243, %c0_244], %237 {strides = array<i32>} : memref<16x512xf32, #tpu.memory_space<vmem>>, vector<16x512xf32>,
    } else {
    }
    %c0 = arith.constant 0 : index
    %c0_1 = arith.constant 0 : index
    %3 = vector.load %arg3[%c0, %c0_1] : memref<1x256xf32, #tpu.memory_space<vmem>>, vector<1x256xf32>
    %c0_2 = arith.constant 0 : index
    %c0_3 = arith.constant 0 : index
    %4 = vector.load %arg4[%c0_2, %c0_3] : memref<1x256xf32, #tpu.memory_space<vmem>>, vector<1x256xf32>
    %c0_4 = arith.constant 0 : index
    %c0_5 = arith.constant 0 : index
    %c0_6 = arith.constant 0 : index
    %5 = vector.load %arg1[%c0_4, %c0_5, %c0_6] : memref<1x8x256xf32, #tpu.memory_space<vmem>>, vector<1x8x256xf32>
    %6 = vector.shape_cast %5 : vector<1x8x256xf32> to vector<8x256xf32>
    %c0_7 = arith.constant 0 : index
    %c0_8 = arith.constant 0 : index
    %c0_9 = arith.constant 0 : index
    %7 = vector.load %arg2[%c0_7, %c0_8, %c0_9] : memref<1x8x256xf32, #tpu.memory_space<vmem>>, vector<1x8x256xf32>
    %8 = vector.shape_cast %7 : vector<1x8x256xf32> to vector<8x256xf32>
    %c0_10 = arith.constant 0 : index
    %c128 = arith.constant 128 : index
    %9 = vector.load %arg16[%c0_10, %c128] : memref<16x512xf32, #tpu.memory_space<vmem>>, vector<8x256xf32>
    tpu.vector_store %arg16[%c0_10, %c128], %6 {strides = array<i32>} : memref<16x512xf32, #tpu.memory_space<vmem>>, vector<8x256xf32>,
    %c0_11 = arith.constant 0 : index
    %c111 = arith.constant 111 : index
    %10 = vector.load %arg16[%c0_11, %c111] : memref<16x512xf32, #tpu.memory_space<vmem>>, vector<8x256xf32>
    %c0_12 = arith.constant 0 : index
    %c0_13 = arith.constant 0 : index
    %11 = vector.load %arg5[%c0_12, %c0_13] : memref<72x8xf32, #tpu.memory_space<vmem>>, vector<8x8xf32>
    %cst = arith.constant dense<0.000000e+00> : vector<8x256xf32>
    %12 = tpu.matmul %11, %10, %cst {dimension_numbers = #tpu.dot_dimension_numbers<[1], [0], [0], [1], [0, 0, 1, 1], [], []>} : vector<8x8xf32>, vector<8x256xf32>, vector<8x256xf32> -> vector<8x256xf32>
    %c0_14 = arith.constant 0 : index
    %c112 = arith.constant 112 : index
    %13 = vector.load %arg16[%c0_14, %c112] : memref<16x512xf32, #tpu.memory_space<vmem>>, vector<8x256xf32>
    %c8 = arith.constant 8 : index
    %c0_15 = arith.constant 0 : index
    %14 = vector.load %arg5[%c8, %c0_15] : memref<72x8xf32, #tpu.memory_space<vmem>>, vector<8x8xf32>
    %cst_16 = arith.constant dense<0.000000e+00> : vector<8x256xf32>
    %15 = tpu.matmul %14, %13, %cst_16 {dimension_numbers = #tpu.dot_dimension_numbers<[1], [0], [0], [1], [0, 0, 1, 1], [], []>} : vector<8x8xf32>, vector<8x256xf32>, vector<8x256xf32> -> vector<8x256xf32>
    %c0_17 = arith.constant 0 : index
    %c113 = arith.constant 113 : index
    %16 = vector.load %arg16[%c0_17, %c113] : memref<16x512xf32, #tpu.memory_space<vmem>>, vector<8x256xf32>
    %c16 = arith.constant 16 : index
    %c0_18 = arith.constant 0 : index
    %17 = vector.load %arg5[%c16, %c0_18] : memref<72x8xf32, #tpu.memory_space<vmem>>, vector<8x8xf32>
    %cst_19 = arith.constant dense<0.000000e+00> : vector<8x256xf32>
    %18 = tpu.matmul %17, %16, %cst_19 {dimension_numbers = #tpu.dot_dimension_numbers<[1], [0], [0], [1], [0, 0, 1, 1], [], []>} : vector<8x8xf32>, vector<8x256xf32>, vector<8x256xf32> -> vector<8x256xf32>
    %c0_20 = arith.constant 0 : index
    %c127 = arith.constant 127 : index
    %19 = vector.load %arg16[%c0_20, %c127] : memref<16x512xf32, #tpu.memory_space<vmem>>, vector<8x256xf32>
    %c24 = arith.constant 24 : index
    %c0_21 = arith.constant 0 : index
    %20 = vector.load %arg5[%c24, %c0_21] : memref<72x8xf32, #tpu.memory_space<vmem>>, vector<8x8xf32>
    %cst_22 = arith.constant dense<0.000000e+00> : vector<8x256xf32>
    %21 = tpu.matmul %20, %19, %cst_22 {dimension_numbers = #tpu.dot_dimension_numbers<[1], [0], [0], [1], [0, 0, 1, 1], [], []>} : vector<8x8xf32>, vector<8x256xf32>, vector<8x256xf32> -> vector<8x256xf32>
    %22 = arith.addf %12, %21 : vector<8x256xf32>
    %c0_23 = arith.constant 0 : index
    %c128_24 = arith.constant 128 : index
    %23 = vector.load %arg16[%c0_23, %c128_24] : memref<16x512xf32, #tpu.memory_space<vmem>>, vector<8x256xf32>
    %c32 = arith.constant 32 : index
    %c0_25 = arith.constant 0 : index
    %24 = vector.load %arg5[%c32, %c0_25] : memref<72x8xf32, #tpu.memory_space<vmem>>, vector<8x8xf32>
    %cst_26 = arith.constant dense<0.000000e+00> : vector<8x256xf32>
    %25 = tpu.matmul %24, %23, %cst_26 {dimension_numbers = #tpu.dot_dimension_numbers<[1], [0], [0], [1], [0, 0, 1, 1], [], []>} : vector<8x8xf32>, vector<8x256xf32>, vector<8x256xf32> -> vector<8x256xf32>
    %26 = arith.addf %15, %25 : vector<8x256xf32>
    %c0_27 = arith.constant 0 : index
    %c129 = arith.constant 129 : index
    %27 = vector.load %arg16[%c0_27, %c129] : memref<16x512xf32, #tpu.memory_space<vmem>>, vector<8x256xf32>
    %c40 = arith.constant 40 : index
    %c0_28 = arith.constant 0 : index
    %28 = vector.load %arg5[%c40, %c0_28] : memref<72x8xf32, #tpu.memory_space<vmem>>, vector<8x8xf32>
    %cst_29 = arith.constant dense<0.000000e+00> : vector<8x256xf32>
    %29 = tpu.matmul %28, %27, %cst_29 {dimension_numbers = #tpu.dot_dimension_numbers<[1], [0], [0], [1], [0, 0, 1, 1], [], []>} : vector<8x8xf32>, vector<8x256xf32>, vector<8x256xf32> -> vector<8x256xf32>
    %30 = arith.addf %18, %29 : vector<8x256xf32>
    %c0_30 = arith.constant 0 : index
    %c143 = arith.constant 143 : index
    %31 = vector.load %arg16[%c0_30, %c143] : memref<16x512xf32, #tpu.memory_space<vmem>>, vector<8x256xf32>
    %c48 = arith.constant 48 : index
    %c0_31 = arith.constant 0 : index
    %32 = vector.load %arg5[%c48, %c0_31] : memref<72x8xf32, #tpu.memory_space<vmem>>, vector<8x8xf32>
    %cst_32 = arith.constant dense<0.000000e+00> : vector<8x256xf32>
    %33 = tpu.matmul %32, %31, %cst_32 {dimension_numbers = #tpu.dot_dimension_numbers<[1], [0], [0], [1], [0, 0, 1, 1], [], []>} : vector<8x8xf32>, vector<8x256xf32>, vector<8x256xf32> -> vector<8x256xf32>
    %34 = arith.addf %22, %33 : vector<8x256xf32>
    %c0_33 = arith.constant 0 : index
    %c144 = arith.constant 144 : index
    %35 = vector.load %arg16[%c0_33, %c144] : memref<16x512xf32, #tpu.memory_space<vmem>>, vector<8x256xf32>
    %c56 = arith.constant 56 : index
    %c0_34 = arith.constant 0 : index
    %36 = vector.load %arg5[%c56, %c0_34] : memref<72x8xf32, #tpu.memory_space<vmem>>, vector<8x8xf32>
    %cst_35 = arith.constant dense<0.000000e+00> : vector<8x256xf32>
    %37 = tpu.matmul %36, %35, %cst_35 {dimension_numbers = #tpu.dot_dimension_numbers<[1], [0], [0], [1], [0, 0, 1, 1], [], []>} : vector<8x8xf32>, vector<8x256xf32>, vector<8x256xf32> -> vector<8x256xf32>
    %38 = arith.addf %26, %37 : vector<8x256xf32>
    %c0_36 = arith.constant 0 : index
    %c145 = arith.constant 145 : index
    %39 = vector.load %arg16[%c0_36, %c145] : memref<16x512xf32, #tpu.memory_space<vmem>>, vector<8x256xf32>
    %c64 = arith.constant 64 : index
    %c0_37 = arith.constant 0 : index
    %40 = vector.load %arg5[%c64, %c0_37] : memref<72x8xf32, #tpu.memory_space<vmem>>, vector<8x8xf32>
    %cst_38 = arith.constant dense<0.000000e+00> : vector<8x256xf32>
    %41 = tpu.matmul %40, %39, %cst_38 {dimension_numbers = #tpu.dot_dimension_numbers<[1], [0], [0], [1], [0, 0, 1, 1], [], []>} : vector<8x8xf32>, vector<8x256xf32>, vector<8x256xf32> -> vector<8x256xf32>
    %42 = arith.addf %30, %41 : vector<8x256xf32>
    %43 = vector.broadcast %3 : vector<1x256xf32> to vector<8x256xf32>
    %44 = arith.mulf %34, %43 : vector<8x256xf32>
    %45 = arith.addf %44, %38 : vector<8x256xf32>
    %46 = vector.broadcast %4 : vector<1x256xf32> to vector<8x256xf32>
    %47 = arith.mulf %42, %46 : vector<8x256xf32>
    %48 = arith.addf %45, %47 : vector<8x256xf32>
    %c0_39 = arith.constant 0 : index
    %c0_40 = arith.constant 0 : index
    %49 = vector.load %arg6[%c0_39, %c0_40] : memref<8x1xf32, #tpu.memory_space<vmem>>, vector<8x1xf32>
    %50 = vector.broadcast %49 : vector<8x1xf32> to vector<8x256xf32>
    %51 = arith.addf %48, %50 : vector<8x256xf32>
    %c0_41 = arith.constant 0 : index
    %c128_42 = arith.constant 128 : index
    %52 = vector.load %arg16[%c0_41, %c128_42] : memref<16x512xf32, #tpu.memory_space<vmem>>, vector<8x256xf32>
    tpu.vector_store %arg16[%c0_41, %c128_42], %8 {strides = array<i32>} : memref<16x512xf32, #tpu.memory_space<vmem>>, vector<8x256xf32>,
    %c0_43 = arith.constant 0 : index
    %c111_44 = arith.constant 111 : index
    %53 = vector.load %arg16[%c0_43, %c111_44] : memref<16x512xf32, #tpu.memory_space<vmem>>, vector<8x256xf32>
    %c0_45 = arith.constant 0 : index
    %c0_46 = arith.constant 0 : index
    %54 = vector.load %arg7[%c0_45, %c0_46] : memref<72x8xf32, #tpu.memory_space<vmem>>, vector<8x8xf32>
    %cst_47 = arith.constant dense<0.000000e+00> : vector<8x256xf32>
    %55 = tpu.matmul %54, %53, %cst_47 {dimension_numbers = #tpu.dot_dimension_numbers<[1], [0], [0], [1], [0, 0, 1, 1], [], []>} : vector<8x8xf32>, vector<8x256xf32>, vector<8x256xf32> -> vector<8x256xf32>
    %c0_48 = arith.constant 0 : index
    %c112_49 = arith.constant 112 : index
    %56 = vector.load %arg16[%c0_48, %c112_49] : memref<16x512xf32, #tpu.memory_space<vmem>>, vector<8x256xf32>
    %c8_50 = arith.constant 8 : index
    %c0_51 = arith.constant 0 : index
    %57 = vector.load %arg7[%c8_50, %c0_51] : memref<72x8xf32, #tpu.memory_space<vmem>>, vector<8x8xf32>
    %cst_52 = arith.constant dense<0.000000e+00> : vector<8x256xf32>
    %58 = tpu.matmul %57, %56, %cst_52 {dimension_numbers = #tpu.dot_dimension_numbers<[1], [0], [0], [1], [0, 0, 1, 1], [], []>} : vector<8x8xf32>, vector<8x256xf32>, vector<8x256xf32> -> vector<8x256xf32>
    %c0_53 = arith.constant 0 : index
    %c113_54 = arith.constant 113 : index
    %59 = vector.load %arg16[%c0_53, %c113_54] : memref<16x512xf32, #tpu.memory_space<vmem>>, vector<8x256xf32>
    %c16_55 = arith.constant 16 : index
    %c0_56 = arith.constant 0 : index
    %60 = vector.load %arg7[%c16_55, %c0_56] : memref<72x8xf32, #tpu.memory_space<vmem>>, vector<8x8xf32>
    %cst_57 = arith.constant dense<0.000000e+00> : vector<8x256xf32>
    %61 = tpu.matmul %60, %59, %cst_57 {dimension_numbers = #tpu.dot_dimension_numbers<[1], [0], [0], [1], [0, 0, 1, 1], [], []>} : vector<8x8xf32>, vector<8x256xf32>, vector<8x256xf32> -> vector<8x256xf32>
    %c0_58 = arith.constant 0 : index
    %c127_59 = arith.constant 127 : index
    %62 = vector.load %arg16[%c0_58, %c127_59] : memref<16x512xf32, #tpu.memory_space<vmem>>, vector<8x256xf32>
    %c24_60 = arith.constant 24 : index
    %c0_61 = arith.constant 0 : index
    %63 = vector.load %arg7[%c24_60, %c0_61] : memref<72x8xf32, #tpu.memory_space<vmem>>, vector<8x8xf32>
    %cst_62 = arith.constant dense<0.000000e+00> : vector<8x256xf32>
    %64 = tpu.matmul %63, %62, %cst_62 {dimension_numbers = #tpu.dot_dimension_numbers<[1], [0], [0], [1], [0, 0, 1, 1], [], []>} : vector<8x8xf32>, vector<8x256xf32>, vector<8x256xf32> -> vector<8x256xf32>
    %65 = arith.addf %55, %64 : vector<8x256xf32>
    %c0_63 = arith.constant 0 : index
    %c128_64 = arith.constant 128 : index
    %66 = vector.load %arg16[%c0_63, %c128_64] : memref<16x512xf32, #tpu.memory_space<vmem>>, vector<8x256xf32>
    %c32_65 = arith.constant 32 : index
    %c0_66 = arith.constant 0 : index
    %67 = vector.load %arg7[%c32_65, %c0_66] : memref<72x8xf32, #tpu.memory_space<vmem>>, vector<8x8xf32>
    %cst_67 = arith.constant dense<0.000000e+00> : vector<8x256xf32>
    %68 = tpu.matmul %67, %66, %cst_67 {dimension_numbers = #tpu.dot_dimension_numbers<[1], [0], [0], [1], [0, 0, 1, 1], [], []>} : vector<8x8xf32>, vector<8x256xf32>, vector<8x256xf32> -> vector<8x256xf32>
    %69 = arith.addf %58, %68 : vector<8x256xf32>
    %c0_68 = arith.constant 0 : index
    %c129_69 = arith.constant 129 : index
    %70 = vector.load %arg16[%c0_68, %c129_69] : memref<16x512xf32, #tpu.memory_space<vmem>>, vector<8x256xf32>
    %c40_70 = arith.constant 40 : index
    %c0_71 = arith.constant 0 : index
    %71 = vector.load %arg7[%c40_70, %c0_71] : memref<72x8xf32, #tpu.memory_space<vmem>>, vector<8x8xf32>
    %cst_72 = arith.constant dense<0.000000e+00> : vector<8x256xf32>
    %72 = tpu.matmul %71, %70, %cst_72 {dimension_numbers = #tpu.dot_dimension_numbers<[1], [0], [0], [1], [0, 0, 1, 1], [], []>} : vector<8x8xf32>, vector<8x256xf32>, vector<8x256xf32> -> vector<8x256xf32>
    %73 = arith.addf %61, %72 : vector<8x256xf32>
    %c0_73 = arith.constant 0 : index
    %c143_74 = arith.constant 143 : index
    %74 = vector.load %arg16[%c0_73, %c143_74] : memref<16x512xf32, #tpu.memory_space<vmem>>, vector<8x256xf32>
    %c48_75 = arith.constant 48 : index
    %c0_76 = arith.constant 0 : index
    %75 = vector.load %arg7[%c48_75, %c0_76] : memref<72x8xf32, #tpu.memory_space<vmem>>, vector<8x8xf32>
    %cst_77 = arith.constant dense<0.000000e+00> : vector<8x256xf32>
    %76 = tpu.matmul %75, %74, %cst_77 {dimension_numbers = #tpu.dot_dimension_numbers<[1], [0], [0], [1], [0, 0, 1, 1], [], []>} : vector<8x8xf32>, vector<8x256xf32>, vector<8x256xf32> -> vector<8x256xf32>
    %77 = arith.addf %65, %76 : vector<8x256xf32>
    %c0_78 = arith.constant 0 : index
    %c144_79 = arith.constant 144 : index
    %78 = vector.load %arg16[%c0_78, %c144_79] : memref<16x512xf32, #tpu.memory_space<vmem>>, vector<8x256xf32>
    %c56_80 = arith.constant 56 : index
    %c0_81 = arith.constant 0 : index
    %79 = vector.load %arg7[%c56_80, %c0_81] : memref<72x8xf32, #tpu.memory_space<vmem>>, vector<8x8xf32>
    %cst_82 = arith.constant dense<0.000000e+00> : vector<8x256xf32>
    %80 = tpu.matmul %79, %78, %cst_82 {dimension_numbers = #tpu.dot_dimension_numbers<[1], [0], [0], [1], [0, 0, 1, 1], [], []>} : vector<8x8xf32>, vector<8x256xf32>, vector<8x256xf32> -> vector<8x256xf32>
    %81 = arith.addf %69, %80 : vector<8x256xf32>
    %c0_83 = arith.constant 0 : index
    %c145_84 = arith.constant 145 : index
    %82 = vector.load %arg16[%c0_83, %c145_84] : memref<16x512xf32, #tpu.memory_space<vmem>>, vector<8x256xf32>
    %c64_85 = arith.constant 64 : index
    %c0_86 = arith.constant 0 : index
    %83 = vector.load %arg7[%c64_85, %c0_86] : memref<72x8xf32, #tpu.memory_space<vmem>>, vector<8x8xf32>
    %cst_87 = arith.constant dense<0.000000e+00> : vector<8x256xf32>
    %84 = tpu.matmul %83, %82, %cst_87 {dimension_numbers = #tpu.dot_dimension_numbers<[1], [0], [0], [1], [0, 0, 1, 1], [], []>} : vector<8x8xf32>, vector<8x256xf32>, vector<8x256xf32> -> vector<8x256xf32>
    %85 = arith.addf %73, %84 : vector<8x256xf32>
    %86 = vector.broadcast %3 : vector<1x256xf32> to vector<8x256xf32>
    %87 = arith.mulf %77, %86 : vector<8x256xf32>
    %88 = arith.addf %87, %81 : vector<8x256xf32>
    %89 = vector.broadcast %4 : vector<1x256xf32> to vector<8x256xf32>
    %90 = arith.mulf %85, %89 : vector<8x256xf32>
    %91 = arith.addf %88, %90 : vector<8x256xf32>
    %c0_88 = arith.constant 0 : index
    %c0_89 = arith.constant 0 : index
    %92 = vector.load %arg8[%c0_88, %c0_89] : memref<8x1xf32, #tpu.memory_space<vmem>>, vector<8x1xf32>
    %93 = vector.broadcast %92 : vector<8x1xf32> to vector<8x256xf32>
    %94 = arith.addf %91, %93 : vector<8x256xf32>
    %c0_90 = arith.constant 0 : index
    %c128_91 = arith.constant 128 : index
    %95 = vector.load %arg16[%c0_90, %c128_91] : memref<16x512xf32, #tpu.memory_space<vmem>>, vector<8x256xf32>
    tpu.vector_store %arg16[%c0_90, %c128_91], %51 {strides = array<i32>} : memref<16x512xf32, #tpu.memory_space<vmem>>, vector<8x256xf32>,
    %c8_92 = arith.constant 8 : index
    %c128_93 = arith.constant 128 : index
    %96 = vector.load %arg16[%c8_92, %c128_93] : memref<16x512xf32, #tpu.memory_space<vmem>>, vector<8x256xf32>
    tpu.vector_store %arg16[%c8_92, %c128_93], %94 {strides = array<i32>} : memref<16x512xf32, #tpu.memory_space<vmem>>, vector<8x256xf32>,
    %c0_94 = arith.constant 0 : index
    %c111_95 = arith.constant 111 : index
    %97 = vector.load %arg16[%c0_94, %c111_95] : memref<16x512xf32, #tpu.memory_space<vmem>>, vector<16x256xf32>
    %c0_96 = arith.constant 0 : index
    %c0_97 = arith.constant 0 : index
    %98 = vector.load %arg9[%c0_96, %c0_97] : memref<72x16xf32, #tpu.memory_space<vmem>>, vector<8x16xf32>
    %cst_98 = arith.constant dense<0.000000e+00> : vector<8x256xf32>
    %99 = tpu.matmul %98, %97, %cst_98 {dimension_numbers = #tpu.dot_dimension_numbers<[1], [0], [0], [1], [0, 0, 1, 1], [], []>} : vector<8x16xf32>, vector<16x256xf32>, vector<8x256xf32> -> vector<8x256xf32>
    %c0_99 = arith.constant 0 : index
    %c112_100 = arith.constant 112 : index
    %100 = vector.load %arg16[%c0_99, %c112_100] : memref<16x512xf32, #tpu.memory_space<vmem>>, vector<16x256xf32>
    %c8_101 = arith.constant 8 : index
    %c0_102 = arith.constant 0 : index
    %101 = vector.load %arg9[%c8_101, %c0_102] : memref<72x16xf32, #tpu.memory_space<vmem>>, vector<8x16xf32>
    %cst_103 = arith.constant dense<0.000000e+00> : vector<8x256xf32>
    %102 = tpu.matmul %101, %100, %cst_103 {dimension_numbers = #tpu.dot_dimension_numbers<[1], [0], [0], [1], [0, 0, 1, 1], [], []>} : vector<8x16xf32>, vector<16x256xf32>, vector<8x256xf32> -> vector<8x256xf32>
    %c0_104 = arith.constant 0 : index
    %c113_105 = arith.constant 113 : index
    %103 = vector.load %arg16[%c0_104, %c113_105] : memref<16x512xf32, #tpu.memory_space<vmem>>, vector<16x256xf32>
    %c16_106 = arith.constant 16 : index
    %c0_107 = arith.constant 0 : index
    %104 = vector.load %arg9[%c16_106, %c0_107] : memref<72x16xf32, #tpu.memory_space<vmem>>, vector<8x16xf32>
    %cst_108 = arith.constant dense<0.000000e+00> : vector<8x256xf32>
    %105 = tpu.matmul %104, %103, %cst_108 {dimension_numbers = #tpu.dot_dimension_numbers<[1], [0], [0], [1], [0, 0, 1, 1], [], []>} : vector<8x16xf32>, vector<16x256xf32>, vector<8x256xf32> -> vector<8x256xf32>
    %c0_109 = arith.constant 0 : index
    %c127_110 = arith.constant 127 : index
    %106 = vector.load %arg16[%c0_109, %c127_110] : memref<16x512xf32, #tpu.memory_space<vmem>>, vector<16x256xf32>
    %c24_111 = arith.constant 24 : index
    %c0_112 = arith.constant 0 : index
    %107 = vector.load %arg9[%c24_111, %c0_112] : memref<72x16xf32, #tpu.memory_space<vmem>>, vector<8x16xf32>
    %cst_113 = arith.constant dense<0.000000e+00> : vector<8x256xf32>
    %108 = tpu.matmul %107, %106, %cst_113 {dimension_numbers = #tpu.dot_dimension_numbers<[1], [0], [0], [1], [0, 0, 1, 1], [], []>} : vector<8x16xf32>, vector<16x256xf32>, vector<8x256xf32> -> vector<8x256xf32>
    %109 = arith.addf %99, %108 : vector<8x256xf32>
    %c0_114 = arith.constant 0 : index
    %c128_115 = arith.constant 128 : index
    %110 = vector.load %arg16[%c0_114, %c128_115] : memref<16x512xf32, #tpu.memory_space<vmem>>, vector<16x256xf32>
    %c32_116 = arith.constant 32 : index
    %c0_117 = arith.constant 0 : index
    %111 = vector.load %arg9[%c32_116, %c0_117] : memref<72x16xf32, #tpu.memory_space<vmem>>, vector<8x16xf32>
    %cst_118 = arith.constant dense<0.000000e+00> : vector<8x256xf32>
    %112 = tpu.matmul %111, %110, %cst_118 {dimension_numbers = #tpu.dot_dimension_numbers<[1], [0], [0], [1], [0, 0, 1, 1], [], []>} : vector<8x16xf32>, vector<16x256xf32>, vector<8x256xf32> -> vector<8x256xf32>
    %113 = arith.addf %102, %112 : vector<8x256xf32>
    %c0_119 = arith.constant 0 : index
    %c129_120 = arith.constant 129 : index
    %114 = vector.load %arg16[%c0_119, %c129_120] : memref<16x512xf32, #tpu.memory_space<vmem>>, vector<16x256xf32>
    %c40_121 = arith.constant 40 : index
    %c0_122 = arith.constant 0 : index
    %115 = vector.load %arg9[%c40_121, %c0_122] : memref<72x16xf32, #tpu.memory_space<vmem>>, vector<8x16xf32>
    %cst_123 = arith.constant dense<0.000000e+00> : vector<8x256xf32>
    %116 = tpu.matmul %115, %114, %cst_123 {dimension_numbers = #tpu.dot_dimension_numbers<[1], [0], [0], [1], [0, 0, 1, 1], [], []>} : vector<8x16xf32>, vector<16x256xf32>, vector<8x256xf32> -> vector<8x256xf32>
    %117 = arith.addf %105, %116 : vector<8x256xf32>
    %c0_124 = arith.constant 0 : index
    %c143_125 = arith.constant 143 : index
    %118 = vector.load %arg16[%c0_124, %c143_125] : memref<16x512xf32, #tpu.memory_space<vmem>>, vector<16x256xf32>
    %c48_126 = arith.constant 48 : index
    %c0_127 = arith.constant 0 : index
    %119 = vector.load %arg9[%c48_126, %c0_127] : memref<72x16xf32, #tpu.memory_space<vmem>>, vector<8x16xf32>
    %cst_128 = arith.constant dense<0.000000e+00> : vector<8x256xf32>
    %120 = tpu.matmul %119, %118, %cst_128 {dimension_numbers = #tpu.dot_dimension_numbers<[1], [0], [0], [1], [0, 0, 1, 1], [], []>} : vector<8x16xf32>, vector<16x256xf32>, vector<8x256xf32> -> vector<8x256xf32>
    %121 = arith.addf %109, %120 : vector<8x256xf32>
    %c0_129 = arith.constant 0 : index
    %c144_130 = arith.constant 144 : index
    %122 = vector.load %arg16[%c0_129, %c144_130] : memref<16x512xf32, #tpu.memory_space<vmem>>, vector<16x256xf32>
    %c56_131 = arith.constant 56 : index
    %c0_132 = arith.constant 0 : index
    %123 = vector.load %arg9[%c56_131, %c0_132] : memref<72x16xf32, #tpu.memory_space<vmem>>, vector<8x16xf32>
    %cst_133 = arith.constant dense<0.000000e+00> : vector<8x256xf32>
    %124 = tpu.matmul %123, %122, %cst_133 {dimension_numbers = #tpu.dot_dimension_numbers<[1], [0], [0], [1], [0, 0, 1, 1], [], []>} : vector<8x16xf32>, vector<16x256xf32>, vector<8x256xf32> -> vector<8x256xf32>
    %125 = arith.addf %113, %124 : vector<8x256xf32>
    %c0_134 = arith.constant 0 : index
    %c145_135 = arith.constant 145 : index
    %126 = vector.load %arg16[%c0_134, %c145_135] : memref<16x512xf32, #tpu.memory_space<vmem>>, vector<16x256xf32>
    %c64_136 = arith.constant 64 : index
    %c0_137 = arith.constant 0 : index
    %127 = vector.load %arg9[%c64_136, %c0_137] : memref<72x16xf32, #tpu.memory_space<vmem>>, vector<8x16xf32>
    %cst_138 = arith.constant dense<0.000000e+00> : vector<8x256xf32>
    %128 = tpu.matmul %127, %126, %cst_138 {dimension_numbers = #tpu.dot_dimension_numbers<[1], [0], [0], [1], [0, 0, 1, 1], [], []>} : vector<8x16xf32>, vector<16x256xf32>, vector<8x256xf32> -> vector<8x256xf32>
    %129 = arith.addf %117, %128 : vector<8x256xf32>
    %130 = vector.broadcast %3 : vector<1x256xf32> to vector<8x256xf32>
    %131 = arith.mulf %121, %130 : vector<8x256xf32>
    %132 = arith.addf %131, %125 : vector<8x256xf32>
    %133 = vector.broadcast %4 : vector<1x256xf32> to vector<8x256xf32>
    %134 = arith.mulf %129, %133 : vector<8x256xf32>
    %135 = arith.addf %132, %134 : vector<8x256xf32>
    %c0_139 = arith.constant 0 : index
    %c0_140 = arith.constant 0 : index
    %136 = vector.load %arg10[%c0_139, %c0_140] : memref<8x1xf32, #tpu.memory_space<vmem>>, vector<8x1xf32>
    %137 = vector.broadcast %136 : vector<8x1xf32> to vector<8x256xf32>
    %138 = arith.addf %135, %137 : vector<8x256xf32>
    %c0_141 = arith.constant 0 : index
    %c128_142 = arith.constant 128 : index
    %139 = vector.load %arg16[%c0_141, %c128_142] : memref<16x512xf32, #tpu.memory_space<vmem>>, vector<8x256xf32>
    tpu.vector_store %arg16[%c0_141, %c128_142], %138 {strides = array<i32>} : memref<16x512xf32, #tpu.memory_space<vmem>>, vector<8x256xf32>,
    %c0_143 = arith.constant 0 : index
    %c111_144 = arith.constant 111 : index
    %140 = vector.load %arg16[%c0_143, %c111_144] : memref<16x512xf32, #tpu.memory_space<vmem>>, vector<8x256xf32>
    %c0_145 = arith.constant 0 : index
    %c0_146 = arith.constant 0 : index
    %141 = vector.load %arg11[%c0_145, %c0_146] : memref<144x8xf32, #tpu.memory_space<vmem>>, vector<16x8xf32>
    %cst_147 = arith.constant dense<0.000000e+00> : vector<16x256xf32>
    %142 = tpu.matmul %141, %140, %cst_147 {dimension_numbers = #tpu.dot_dimension_numbers<[1], [0], [0], [1], [0, 0, 1, 1], [], []>} : vector<16x8xf32>, vector<8x256xf32>, vector<16x256xf32> -> vector<16x256xf32>
    %c0_148 = arith.constant 0 : index
    %c112_149 = arith.constant 112 : index
    %143 = vector.load %arg16[%c0_148, %c112_149] : memref<16x512xf32, #tpu.memory_space<vmem>>, vector<8x256xf32>
    %c16_150 = arith.constant 16 : index
    %c0_151 = arith.constant 0 : index
    %144 = vector.load %arg11[%c16_150, %c0_151] : memref<144x8xf32, #tpu.memory_space<vmem>>, vector<16x8xf32>
    %cst_152 = arith.constant dense<0.000000e+00> : vector<16x256xf32>
    %145 = tpu.matmul %144, %143, %cst_152 {dimension_numbers = #tpu.dot_dimension_numbers<[1], [0], [0], [1], [0, 0, 1, 1], [], []>} : vector<16x8xf32>, vector<8x256xf32>, vector<16x256xf32> -> vector<16x256xf32>
    %c0_153 = arith.constant 0 : index
    %c113_154 = arith.constant 113 : index
    %146 = vector.load %arg16[%c0_153, %c113_154] : memref<16x512xf32, #tpu.memory_space<vmem>>, vector<8x256xf32>
    %c32_155 = arith.constant 32 : index
    %c0_156 = arith.constant 0 : index
    %147 = vector.load %arg11[%c32_155, %c0_156] : memref<144x8xf32, #tpu.memory_space<vmem>>, vector<16x8xf32>
    %cst_157 = arith.constant dense<0.000000e+00> : vector<16x256xf32>
    %148 = tpu.matmul %147, %146, %cst_157 {dimension_numbers = #tpu.dot_dimension_numbers<[1], [0], [0], [1], [0, 0, 1, 1], [], []>} : vector<16x8xf32>, vector<8x256xf32>, vector<16x256xf32> -> vector<16x256xf32>
    %c0_158 = arith.constant 0 : index
    %c127_159 = arith.constant 127 : index
    %149 = vector.load %arg16[%c0_158, %c127_159] : memref<16x512xf32, #tpu.memory_space<vmem>>, vector<8x256xf32>
    %c48_160 = arith.constant 48 : index
    %c0_161 = arith.constant 0 : index
    %150 = vector.load %arg11[%c48_160, %c0_161] : memref<144x8xf32, #tpu.memory_space<vmem>>, vector<16x8xf32>
    %cst_162 = arith.constant dense<0.000000e+00> : vector<16x256xf32>
    %151 = tpu.matmul %150, %149, %cst_162 {dimension_numbers = #tpu.dot_dimension_numbers<[1], [0], [0], [1], [0, 0, 1, 1], [], []>} : vector<16x8xf32>, vector<8x256xf32>, vector<16x256xf32> -> vector<16x256xf32>
    %152 = arith.addf %142, %151 : vector<16x256xf32>
    %c0_163 = arith.constant 0 : index
    %c128_164 = arith.constant 128 : index
    %153 = vector.load %arg16[%c0_163, %c128_164] : memref<16x512xf32, #tpu.memory_space<vmem>>, vector<8x256xf32>
    %c64_165 = arith.constant 64 : index
    %c0_166 = arith.constant 0 : index
    %154 = vector.load %arg11[%c64_165, %c0_166] : memref<144x8xf32, #tpu.memory_space<vmem>>, vector<16x8xf32>
    %cst_167 = arith.constant dense<0.000000e+00> : vector<16x256xf32>
    %155 = tpu.matmul %154, %153, %cst_167 {dimension_numbers = #tpu.dot_dimension_numbers<[1], [0], [0], [1], [0, 0, 1, 1], [], []>} : vector<16x8xf32>, vector<8x256xf32>, vector<16x256xf32> -> vector<16x256xf32>
    %156 = arith.addf %145, %155 : vector<16x256xf32>
    %c0_168 = arith.constant 0 : index
    %c129_169 = arith.constant 129 : index
    %157 = vector.load %arg16[%c0_168, %c129_169] : memref<16x512xf32, #tpu.memory_space<vmem>>, vector<8x256xf32>
    %c80 = arith.constant 80 : index
    %c0_170 = arith.constant 0 : index
    %158 = vector.load %arg11[%c80, %c0_170] : memref<144x8xf32, #tpu.memory_space<vmem>>, vector<16x8xf32>
    %cst_171 = arith.constant dense<0.000000e+00> : vector<16x256xf32>
    %159 = tpu.matmul %158, %157, %cst_171 {dimension_numbers = #tpu.dot_dimension_numbers<[1], [0], [0], [1], [0, 0, 1, 1], [], []>} : vector<16x8xf32>, vector<8x256xf32>, vector<16x256xf32> -> vector<16x256xf32>
    %160 = arith.addf %148, %159 : vector<16x256xf32>
    %c0_172 = arith.constant 0 : index
    %c143_173 = arith.constant 143 : index
    %161 = vector.load %arg16[%c0_172, %c143_173] : memref<16x512xf32, #tpu.memory_space<vmem>>, vector<8x256xf32>
    %c96 = arith.constant 96 : index
    %c0_174 = arith.constant 0 : index
    %162 = vector.load %arg11[%c96, %c0_174] : memref<144x8xf32, #tpu.memory_space<vmem>>, vector<16x8xf32>
    %cst_175 = arith.constant dense<0.000000e+00> : vector<16x256xf32>
    %163 = tpu.matmul %162, %161, %cst_175 {dimension_numbers = #tpu.dot_dimension_numbers<[1], [0], [0], [1], [0, 0, 1, 1], [], []>} : vector<16x8xf32>, vector<8x256xf32>, vector<16x256xf32> -> vector<16x256xf32>
    %164 = arith.addf %152, %163 : vector<16x256xf32>
    %c0_176 = arith.constant 0 : index
    %c144_177 = arith.constant 144 : index
    %165 = vector.load %arg16[%c0_176, %c144_177] : memref<16x512xf32, #tpu.memory_space<vmem>>, vector<8x256xf32>
    %c112_178 = arith.constant 112 : index
    %c0_179 = arith.constant 0 : index
    %166 = vector.load %arg11[%c112_178, %c0_179] : memref<144x8xf32, #tpu.memory_space<vmem>>, vector<16x8xf32>
    %cst_180 = arith.constant dense<0.000000e+00> : vector<16x256xf32>
    %167 = tpu.matmul %166, %165, %cst_180 {dimension_numbers = #tpu.dot_dimension_numbers<[1], [0], [0], [1], [0, 0, 1, 1], [], []>} : vector<16x8xf32>, vector<8x256xf32>, vector<16x256xf32> -> vector<16x256xf32>
    %168 = arith.addf %156, %167 : vector<16x256xf32>
    %c0_181 = arith.constant 0 : index
    %c145_182 = arith.constant 145 : index
    %169 = vector.load %arg16[%c0_181, %c145_182] : memref<16x512xf32, #tpu.memory_space<vmem>>, vector<8x256xf32>
    %c128_183 = arith.constant 128 : index
    %c0_184 = arith.constant 0 : index
    %170 = vector.load %arg11[%c128_183, %c0_184] : memref<144x8xf32, #tpu.memory_space<vmem>>, vector<16x8xf32>
    %cst_185 = arith.constant dense<0.000000e+00> : vector<16x256xf32>
    %171 = tpu.matmul %170, %169, %cst_185 {dimension_numbers = #tpu.dot_dimension_numbers<[1], [0], [0], [1], [0, 0, 1, 1], [], []>} : vector<16x8xf32>, vector<8x256xf32>, vector<16x256xf32> -> vector<16x256xf32>
    %172 = arith.addf %160, %171 : vector<16x256xf32>
    %173 = vector.broadcast %3 : vector<1x256xf32> to vector<16x256xf32>
    %174 = arith.mulf %164, %173 : vector<16x256xf32>
    %175 = arith.addf %174, %168 : vector<16x256xf32>
    %176 = vector.broadcast %4 : vector<1x256xf32> to vector<16x256xf32>
    %177 = arith.mulf %172, %176 : vector<16x256xf32>
    %178 = arith.addf %175, %177 : vector<16x256xf32>
    %c0_186 = arith.constant 0 : index
    %c0_187 = arith.constant 0 : index
    %179 = vector.load %arg12[%c0_186, %c0_187] : memref<16x1xf32, #tpu.memory_space<vmem>>, vector<16x1xf32>
    %180 = vector.broadcast %179 : vector<16x1xf32> to vector<16x256xf32>
    %181 = arith.addf %178, %180 : vector<16x256xf32>
    %cst_188 = arith.constant 0.000000e+00 : f32
    %182 = vector.broadcast %cst_188 : f32 to vector<16x256xf32>
    %183 = arith.cmpf oge, %181, %182 : vector<16x256xf32>
    %cst_189 = arith.constant 1.000000e-01 : f32
    %184 = vector.broadcast %cst_189 : f32 to vector<16x256xf32>
    %185 = arith.mulf %184, %181 : vector<16x256xf32>
    %186 = arith.select %183, %181, %185 : vector<16x256xi1>, vector<16x256xf32>
    %c0_190 = arith.constant 0 : index
    %c128_191 = arith.constant 128 : index
    %187 = vector.load %arg16[%c0_190, %c128_191] : memref<16x512xf32, #tpu.memory_space<vmem>>, vector<16x256xf32>
    tpu.vector_store %arg16[%c0_190, %c128_191], %186 {strides = array<i32>} : memref<16x512xf32, #tpu.memory_space<vmem>>, vector<16x256xf32>,
    %c0_192 = arith.constant 0 : index
    %c111_193 = arith.constant 111 : index
    %188 = vector.load %arg16[%c0_192, %c111_193] : memref<16x512xf32, #tpu.memory_space<vmem>>, vector<16x256xf32>
    %c0_194 = arith.constant 0 : index
    %c0_195 = arith.constant 0 : index
    %189 = vector.load %arg13[%c0_194, %c0_195] : memref<144x16xf32, #tpu.memory_space<vmem>>, vector<16x16xf32>
    %cst_196 = arith.constant dense<0.000000e+00> : vector<16x256xf32>
    %190 = tpu.matmul %189, %188, %cst_196 {dimension_numbers = #tpu.dot_dimension_numbers<[1], [0], [0], [1], [0, 0, 1, 1], [], []>} : vector<16x16xf32>, vector<16x256xf32>, vector<16x256xf32> -> vector<16x256xf32>
    %c0_197 = arith.constant 0 : index
    %c112_198 = arith.constant 112 : index
    %191 = vector.load %arg16[%c0_197, %c112_198] : memref<16x512xf32, #tpu.memory_space<vmem>>, vector<16x256xf32>
    %c16_199 = arith.constant 16 : index
    %c0_200 = arith.constant 0 : index
    %192 = vector.load %arg13[%c16_199, %c0_200] : memref<144x16xf32, #tpu.memory_space<vmem>>, vector<16x16xf32>
    %cst_201 = arith.constant dense<0.000000e+00> : vector<16x256xf32>
    %193 = tpu.matmul %192, %191, %cst_201 {dimension_numbers = #tpu.dot_dimension_numbers<[1], [0], [0], [1], [0, 0, 1, 1], [], []>} : vector<16x16xf32>, vector<16x256xf32>, vector<16x256xf32> -> vector<16x256xf32>
    %c0_202 = arith.constant 0 : index
    %c113_203 = arith.constant 113 : index
    %194 = vector.load %arg16[%c0_202, %c113_203] : memref<16x512xf32, #tpu.memory_space<vmem>>, vector<16x256xf32>
    %c32_204 = arith.constant 32 : index
    %c0_205 = arith.constant 0 : index
    %195 = vector.load %arg13[%c32_204, %c0_205] : memref<144x16xf32, #tpu.memory_space<vmem>>, vector<16x16xf32>
    %cst_206 = arith.constant dense<0.000000e+00> : vector<16x256xf32>
    %196 = tpu.matmul %195, %194, %cst_206 {dimension_numbers = #tpu.dot_dimension_numbers<[1], [0], [0], [1], [0, 0, 1, 1], [], []>} : vector<16x16xf32>, vector<16x256xf32>, vector<16x256xf32> -> vector<16x256xf32>
    %c0_207 = arith.constant 0 : index
    %c127_208 = arith.constant 127 : index
    %197 = vector.load %arg16[%c0_207, %c127_208] : memref<16x512xf32, #tpu.memory_space<vmem>>, vector<16x256xf32>
    %c48_209 = arith.constant 48 : index
    %c0_210 = arith.constant 0 : index
    %198 = vector.load %arg13[%c48_209, %c0_210] : memref<144x16xf32, #tpu.memory_space<vmem>>, vector<16x16xf32>
    %cst_211 = arith.constant dense<0.000000e+00> : vector<16x256xf32>
    %199 = tpu.matmul %198, %197, %cst_211 {dimension_numbers = #tpu.dot_dimension_numbers<[1], [0], [0], [1], [0, 0, 1, 1], [], []>} : vector<16x16xf32>, vector<16x256xf32>, vector<16x256xf32> -> vector<16x256xf32>
    %200 = arith.addf %190, %199 : vector<16x256xf32>
    %c0_212 = arith.constant 0 : index
    %c128_213 = arith.constant 128 : index
    %201 = vector.load %arg16[%c0_212, %c128_213] : memref<16x512xf32, #tpu.memory_space<vmem>>, vector<16x256xf32>
    %c64_214 = arith.constant 64 : index
    %c0_215 = arith.constant 0 : index
    %202 = vector.load %arg13[%c64_214, %c0_215] : memref<144x16xf32, #tpu.memory_space<vmem>>, vector<16x16xf32>
    %cst_216 = arith.constant dense<0.000000e+00> : vector<16x256xf32>
    %203 = tpu.matmul %202, %201, %cst_216 {dimension_numbers = #tpu.dot_dimension_numbers<[1], [0], [0], [1], [0, 0, 1, 1], [], []>} : vector<16x16xf32>, vector<16x256xf32>, vector<16x256xf32> -> vector<16x256xf32>
    %204 = arith.addf %193, %203 : vector<16x256xf32>
    %c0_217 = arith.constant 0 : index
    %c129_218 = arith.constant 129 : index
    %205 = vector.load %arg16[%c0_217, %c129_218] : memref<16x512xf32, #tpu.memory_space<vmem>>, vector<16x256xf32>
    %c80_219 = arith.constant 80 : index
    %c0_220 = arith.constant 0 : index
    %206 = vector.load %arg13[%c80_219, %c0_220] : memref<144x16xf32, #tpu.memory_space<vmem>>, vector<16x16xf32>
    %cst_221 = arith.constant dense<0.000000e+00> : vector<16x256xf32>
    %207 = tpu.matmul %206, %205, %cst_221 {dimension_numbers = #tpu.dot_dimension_numbers<[1], [0], [0], [1], [0, 0, 1, 1], [], []>} : vector<16x16xf32>, vector<16x256xf32>, vector<16x256xf32> -> vector<16x256xf32>
    %208 = arith.addf %196, %207 : vector<16x256xf32>
    %c0_222 = arith.constant 0 : index
    %c143_223 = arith.constant 143 : index
    %209 = vector.load %arg16[%c0_222, %c143_223] : memref<16x512xf32, #tpu.memory_space<vmem>>, vector<16x256xf32>
    %c96_224 = arith.constant 96 : index
    %c0_225 = arith.constant 0 : index
    %210 = vector.load %arg13[%c96_224, %c0_225] : memref<144x16xf32, #tpu.memory_space<vmem>>, vector<16x16xf32>
    %cst_226 = arith.constant dense<0.000000e+00> : vector<16x256xf32>
    %211 = tpu.matmul %210, %209, %cst_226 {dimension_numbers = #tpu.dot_dimension_numbers<[1], [0], [0], [1], [0, 0, 1, 1], [], []>} : vector<16x16xf32>, vector<16x256xf32>, vector<16x256xf32> -> vector<16x256xf32>
    %212 = arith.addf %200, %211 : vector<16x256xf32>
    %c0_227 = arith.constant 0 : index
    %c144_228 = arith.constant 144 : index
    %213 = vector.load %arg16[%c0_227, %c144_228] : memref<16x512xf32, #tpu.memory_space<vmem>>, vector<16x256xf32>
    %c112_229 = arith.constant 112 : index
    %c0_230 = arith.constant 0 : index
    %214 = vector.load %arg13[%c112_229, %c0_230] : memref<144x16xf32, #tpu.memory_space<vmem>>, vector<16x16xf32>
    %cst_231 = arith.constant dense<0.000000e+00> : vector<16x256xf32>
    %215 = tpu.matmul %214, %213, %cst_231 {dimension_numbers = #tpu.dot_dimension_numbers<[1], [0], [0], [1], [0, 0, 1, 1], [], []>} : vector<16x16xf32>, vector<16x256xf32>, vector<16x256xf32> -> vector<16x256xf32>
    %216 = arith.addf %204, %215 : vector<16x256xf32>
    %c0_232 = arith.constant 0 : index
    %c145_233 = arith.constant 145 : index
    %217 = vector.load %arg16[%c0_232, %c145_233] : memref<16x512xf32, #tpu.memory_space<vmem>>, vector<16x256xf32>
    %c128_234 = arith.constant 128 : index
    %c0_235 = arith.constant 0 : index
    %218 = vector.load %arg13[%c128_234, %c0_235] : memref<144x16xf32, #tpu.memory_space<vmem>>, vector<16x16xf32>
    %cst_236 = arith.constant dense<0.000000e+00> : vector<16x256xf32>
    %219 = tpu.matmul %218, %217, %cst_236 {dimension_numbers = #tpu.dot_dimension_numbers<[1], [0], [0], [1], [0, 0, 1, 1], [], []>} : vector<16x16xf32>, vector<16x256xf32>, vector<16x256xf32> -> vector<16x256xf32>
    %220 = arith.addf %208, %219 : vector<16x256xf32>
    %221 = vector.broadcast %3 : vector<1x256xf32> to vector<16x256xf32>
    %222 = arith.mulf %212, %221 : vector<16x256xf32>
    %223 = arith.addf %222, %216 : vector<16x256xf32>
    %224 = vector.broadcast %4 : vector<1x256xf32> to vector<16x256xf32>
    %225 = arith.mulf %220, %224 : vector<16x256xf32>
    %226 = arith.addf %223, %225 : vector<16x256xf32>
    %c0_237 = arith.constant 0 : index
    %c0_238 = arith.constant 0 : index
    %227 = vector.load %arg14[%c0_237, %c0_238] : memref<16x1xf32, #tpu.memory_space<vmem>>, vector<16x1xf32>
    %228 = vector.broadcast %227 : vector<16x1xf32> to vector<16x256xf32>
    %229 = arith.addf %226, %228 : vector<16x256xf32>
    %230 = vector.extract_strided_slice %229 {offsets = [0, 0], sizes = [8, 256], strides = [1, 1]} : vector<16x256xf32> to vector<8x256xf32>
    %231 = arith.mulf %8, %230 : vector<8x256xf32>
    %232 = vector.extract_strided_slice %229 {offsets = [8, 0], sizes = [8, 256], strides = [1, 1]} : vector<16x256xf32> to vector<8x256xf32>
    %233 = arith.addf %231, %232 : vector<8x256xf32>
    %c0_239 = arith.constant 0 : index
    %c0_240 = arith.constant 0 : index
    %c0_241 = arith.constant 0 : index
    %234 = vector.load %arg15[%c0_239, %c0_240, %c0_241] : memref<1x8x256xf32, #tpu.memory_space<vmem>>, vector<1x8x256xf32>
    %235 = vector.shape_cast %234 : vector<1x8x256xf32> to vector<8x256xf32>
    %236 = vector.shape_cast %233 : vector<8x256xf32> to vector<1x8x256xf32>
    tpu.vector_store %arg15[%c0_239, %c0_240, %c0_241], %236 {strides = array<i32>} : memref<1x8x256xf32, #tpu.memory_space<vmem>>, vector<1x8x256xf32>,
    return
  }
  func.func @transform_0(%arg0: i32) -> (i32, i32, i32) {
    %c0_i32 = arith.constant 0 : i32
    %c0_i32_0 = arith.constant 0 : i32
    %c0_i32_1 = arith.constant 0 : i32
    return %arg0, %c0_i32, %c0_i32_0 : i32, i32, i32
  }
  func.func @transform_1(%arg0: i32) -> (i32, i32, i32) {
    %c0_i32 = arith.constant 0 : i32
    %c0_i32_0 = arith.constant 0 : i32
    %c0_i32_1 = arith.constant 0 : i32
    return %arg0, %c0_i32, %c0_i32_0 : i32, i32, i32
  }
  func.func @transform_2(%arg0: i32) -> (i32, i32) {
    %c0_i32 = arith.constant 0 : i32
    %c0_i32_0 = arith.constant 0 : i32
    %c0_i32_1 = arith.constant 0 : i32
    return %c0_i32, %c0_i32_0 : i32, i32
  }
  func.func @transform_3(%arg0: i32) -> (i32, i32) {
    %c0_i32 = arith.constant 0 : i32
    %c0_i32_0 = arith.constant 0 : i32
    %c0_i32_1 = arith.constant 0 : i32
    return %c0_i32, %c0_i32_0 : i32, i32
  }
  func.func @transform_4(%arg0: i32) -> (i32, i32) {
    %c0_i32 = arith.constant 0 : i32
    %c0_i32_0 = arith.constant 0 : i32
    %c0_i32_1 = arith.constant 0 : i32
    return %c0_i32, %c0_i32_0 : i32, i32
  }
  func.func @transform_5(%arg0: i32) -> (i32, i32) {
    %c0_i32 = arith.constant 0 : i32
    %c0_i32_0 = arith.constant 0 : i32
    %c0_i32_1 = arith.constant 0 : i32
    return %c0_i32, %c0_i32_0 : i32, i32
  }
  func.func @transform_6(%arg0: i32) -> (i32, i32) {
    %c0_i32 = arith.constant 0 : i32
    %c0_i32_0 = arith.constant 0 : i32
    %c0_i32_1 = arith.constant 0 : i32
    return %c0_i32, %c0_i32_0 : i32, i32
  }
  func.func @transform_7(%arg0: i32) -> (i32, i32) {
    %c0_i32 = arith.constant 0 : i32
    %c0_i32_0 = arith.constant 0 : i32
    %c0_i32_1 = arith.constant 0 : i32
    return %c0_i32, %c0_i32_0 : i32, i32
  }
  func.func @transform_8(%arg0: i32) -> (i32, i32) {
    %c0_i32 = arith.constant 0 : i32
    %c0_i32_0 = arith.constant 0 : i32
    %c0_i32_1 = arith.constant 0 : i32
    return %c0_i32, %c0_i32_0 : i32, i32
  }
  func.func @transform_9(%arg0: i32) -> (i32, i32) {
    %c0_i32 = arith.constant 0 : i32
    %c0_i32_0 = arith.constant 0 : i32
    %c0_i32_1 = arith.constant 0 : i32
    return %c0_i32, %c0_i32_0 : i32, i32
  }
  func.func @transform_10(%arg0: i32) -> (i32, i32) {
    %c0_i32 = arith.constant 0 : i32
    %c0_i32_0 = arith.constant 0 : i32
    %c0_i32_1 = arith.constant 0 : i32
    return %c0_i32, %c0_i32_0 : i32, i32
  }
  func.func @transform_11(%arg0: i32) -> (i32, i32) {
    %c0_i32 = arith.constant 0 : i32
    %c0_i32_0 = arith.constant 0 : i32
    %c0_i32_1 = arith.constant 0 : i32
    return %c0_i32, %c0_i32_0 : i32, i32
  }
  func.func @transform_12(%arg0: i32) -> (i32, i32) {
    %c0_i32 = arith.constant 0 : i32
    %c0_i32_0 = arith.constant 0 : i32
    %c0_i32_1 = arith.constant 0 : i32
    return %c0_i32, %c0_i32_0 : i32, i32
  }
  func.func @transform_13(%arg0: i32) -> (i32, i32) {
    %c0_i32 = arith.constant 0 : i32
    %c0_i32_0 = arith.constant 0 : i32
    %c0_i32_1 = arith.constant 0 : i32
    return %c0_i32, %c0_i32_0 : i32, i32
  }
  func.func @transform_14(%arg0: i32) -> (i32, i32, i32) {
    %c0_i32 = arith.constant 0 : i32
    %c0_i32_0 = arith.constant 0 : i32
    %c0_i32_1 = arith.constant 0 : i32
    return %arg0, %c0_i32, %c0_i32_0 : i32, i32, i32
  }
}

</mosaic_0001>

<bundles_post_ra>
// kernel: tpu_custom_call.1
= control target key start
LH: loop header
LB: loop body
LE: loop exit
PB: predicated region body
PF: predicated region fallthrough
CT: control target
= control target key end

     0   :  { %s6392_s0 = inlined_call_operand.vmem [shape: f32[2,8,256], index: 0, kind: input, shape index: {}]   ;;  %s6393_s1 = inlined_call_operand.vmem [shape: f32[2,8,256], index: 1, kind: input, shape index: {}]   ;;  %s6394_s2 = inlined_call_operand.vmem [shape: f32[1,256], index: 2, kind: input, shape index: {}]   ;;  %s6395_s3 = inlined_call_operand.vmem [shape: f32[1,256], index: 3, kind: input, shape index: {}]   ;;  %s6396_s4 = inlined_call_operand.vmem [shape: f32[72,8], index: 4, kind: input, shape index: {}]   ;;  %s6397_s5 = inlined_call_operand.vmem [shape: f32[8,1], index: 5, kind: input, shape index: {}]   ;;  %s6398_s6 = inlined_call_operand.vmem [shape: f32[72,8], index: 6, kind: input, shape index: {}]   ;;  %s6399_s7 = inlined_call_operand.vmem [shape: f32[8,1], index: 7, kind: input, shape index: {}]   ;;  %s6400_s8 = inlined_call_operand.vmem [shape: f32[72,16], index: 8, kind: input, shape index: {}]   ;;  %s6401_s9 = inlined_call_operand.vmem [shape: f32[8,1], index: 9, kind: input, shape index: {}]   ;;  %s6402_s10 = inlined_call_operand.vmem [shape: f32[144,8], index: 10, kind: input, shape index: {}]   ;;  %s6403_s11 = inlined_call_operand.vmem [shape: f32[16,1], index: 11, kind: input, shape index: {}]   ;;  %s6404_s12 = inlined_call_operand.vmem [shape: f32[144,16], index: 12, kind: input, shape index: {}]   ;;  %s6405_s13 = inlined_call_operand.vmem [shape: f32[16,1], index: 13, kind: input, shape index: {}]   ;;  %s6406_s14 = inlined_call_operand.hbm [shape: f32[2,8,256], index: 14, kind: output, shape index: {}]  }
   0x1   :  { %6428 = sst [smem:[#allocation10_spill]] %s6392_s0 }
   0x2   :  { %6429 = sst [smem:[#allocation11_spill]] %s6393_s1 }
   0x3   :  { %6430 = sst [smem:[#allocation12_spill]] %s6394_s2 }
   0x4   :  { %6431 = sst [smem:[#allocation13_spill]] %s6395_s3 }
   0x5   :  { %6432 = sst [smem:[#allocation14_spill]] %s6396_s4 }
   0x6   :  { %19 = vsyncpa [#allocation4], 0 }
   0x7   :  { %21 = vsyncpa [#allocation4 + $0x1], 0  ;;  %s5290_s29 = smov 0   ;;  %s5292_s30 = smov 0  }
   0x8   :  { %s5294_s15 = smov 0   ;;  %s5296_s16 = smov 0  }
   0x9 LB: > { %6433 = sst [smem:[#allocation6_spill]] %s5197_s15  ;;  %s5311_s17 = sadd.s32 4294967295, %s5201_s16   ;;  %s5201_s16 = sphi %s5296_s16, %s6454_s16   ;;  %s5197_s15 = sphi %s5294_s15, %s6456_s15   ;;  %s5193_s30 = sphi %s5292_s30, %s6458_s30   ;;  %s5189_s29 = sphi %s5290_s29, %s6457_s29  }
   0xa   : > { %s5006_s18 = sadd.s32 4294967294, %s5201_s16   ;;  %s5315_s19 = sadd.s32 1, %s5201_s16  }
   0xb   : > { %6434 = sst [smem:[#allocation7_spill]] %s5315_s19  ;;  %s338_s20 = sadd.s32 1, %s5197_s15 }
   0xc   : > { %s335_s21 = ssub.s32 %s5201_s16, %s5315_s19  ;;  %p348_p0 = scmp.ne.s32.totalorder %s5197_s15, %s5193_s30 }
   0xd   : > { %p336_p1 = scmp.eq.s32.totalorder %s335_s21, 0  ;;  %p349_p2 = scmp.eq.s32.totalorder %s5311_s17, 1 }
   0xe   : > { %p354_p3 = scmp.ne.s32.totalorder %s5193_s30, %s5189_s29  ;;  %p355_p4 = scmp.eq.s32.totalorder %s5006_s18, 1 }
   0xf   : > { %s5326_s22 = scalar_select %p336_p1, %s5197_s15, %s338_s20  }
  0x10   : > { %p5328_p5 = por %p349_p2, %p348_p0  ;;  %p5332_p6 = por %p355_p4, %p354_p3 }
  0x11   : > { %6435 = sst [smem:[#allocation8_spill]] %s5326_s22  ;;  %p5009_p7 = scmp.ge.s32.totalorder %s5201_s16, 1 }
  0x12   : > { %s6437_s24 = scalar_select %p5332_p6, 1, 0 }
  0x13   : > { %p425_p8 = scmp.lt.s32.totalorder %s5201_s16, 3 }
  0x14   : > { %6438 = sst [smem:[#allocation9_spill]] %s6437_s24 }
  0x15   : > { %p426_p9 = pnand %p5009_p7, %p425_p8 }
  0x16   : > { %s6411_s25 = sand.u32 (!%p426_p9), 1, %s5193_s30   ;;  %p476_p10 = scmp.lt.s32.totalorder (!%p426_p9), %s5311_s17, 1 }
  0x17   : > { %429 = sbr.rel (%p426_p9) target bundleno = 1579 (0x62b), region = 76  ;;  %s5010_s26 = sshll.u32 (!%p426_p9), %s6411_s25, 4 }
  0x18   : > { %s6439_s0 = sld [smem:[#allocation10_spill]] (!%p426_p9)  ;;  %s5351_s24 = scalar_lea.vmem (!%p426_p9), [#allocation3], %s5010_s26 }
  0x19   : > { %s6440_s1 = sld [smem:[#allocation11_spill]] (!%p426_p9)  ;;  %p5015_p11 = scmp.ne.s32.totalorder (!%p426_p9), %s5311_s17, 0 }
  0x1c   : > { %s477_s27 = scalar_select %p476_p10, %s5311_s17, 1 }
  0x1d   : > { %489 = sbr.rel (%p5015_p11) target bundleno = 37 (0x25), region = 80 }
  0x1e   : > { %s5084_s28 = sshll.u32 %s477_s27, 4 }
  0x1f   : > { %s480_s21 = scalar_lea.vmem %s6439_s0, %s5084_s28  ;;  %s5349_s19 = scalar_lea.vmem %s6440_s1, %s5084_s28 }
  0x22   : > { %v5203_v0 = vmov 0.0  }
  0x23   : > { %490 = vst [vmem:[#allocation2 + $0x30] sm:$0xff] %v5203_v0  ;;  %493 = vst [vmem:[#allocation2 + $0x10] sm:$0xff] %v5203_v0 }
  0x24   : > { %494 = vst [vmem:[#allocation2 + $0x8] sm:$0xff] %v5203_v0  ;;  %497 = vst [vmem:[#allocation2 + $0x38] sm:$0xff] %v5203_v0 }
  0x25 PF: > { %s6424_s27 = smov 17   ;;  %s6426_s15 = smov 1   ;;  %v5360_v2 = vld [vmem:[%s480_s21] sm:$0xff]  ;;  %v5206_v3 = vmov 0.0   ;;  %v5368_v4 = vld [vmem:[%s480_s21 + $0x8] sm:$0xff]  ;;  %v5213_v8 = vmov 0  }
  0x26   : > { %680 = vmatprep.mubr.f32.mxu1 %v5206_v3  ;;  %595 = vmatprep.mubr.f32.mxu0 %v5206_v3  ;;  %s6414_s22 = smov 16   ;;  %s6422_s26 = smov 127   ;;  %v5409_v6 = vld [vmem:[%s5349_s19] sm:$0xff]  ;;  %v5416_v7 = vld [vmem:[%s5349_s19 + $0x8] sm:$0xff]  ;;  %vm522_vm0 = vcmask 7168   ;;  %vm608_vm1 = vcmask 138240  }
  0x27   : > { %s6412_s28 = smov 15   ;;  %s6416_s18 = smov 113   ;;  %5138 = vset.pattern.permute.xlu1 %v5213_v8  ;;  %5137 = vset.pattern.permute.xlu0 %v5213_v8  ;;  %v1318_v9 = vld [vmem:[%s6397_s5] sm:$0xff]  ;;  %vm527_vm2 = vcmask 64512   ;;  %vm768_vm3 = vcmask 130048   ;;  %vm860_vm4 = vcmask 1039360  }
  0x28   : > { %s6420_s20 = smov 112   ;;  %s6418_s21 = smov 111   ;;  %v2109_v10 = vld [vmem:[%s6399_s7] sm:$0xff]  ;;  %vm945_vm5 = vcmask 121856   ;;  %vm1031_vm6 = vcmask 924672   ;;  %vm1119_vm7 = vcmask 916480  }
  0x29   : > { %s6441_s4 = sld [smem:[#allocation14_spill]]  ;;  %vm1207_vm8 = vcmask 908288   ;;  %s6443_s25 = smov 16  }
  0x2a   : > { %v5354_v1 = vld [vmem:[#allocation2 + $0x30] sm:$0xff]  ;;  %s6446_s2 = sld [smem:[#allocation12_spill]]  ;;  %s6451_s0 = smov 1  }
  0x2b   : > { %602 = vrot.lane.b32.xlu1 %v5354_v1, %s6424_s27  ;;  %516 = vrot.lane.b32.xlu0 %v5354_v1, %s6426_s15  ;;  %v5382_v5 = vld [vmem:[#allocation2 + $0x10] sm:$0xff]  ;;  %s6447_s3 = sld [smem:[#allocation13_spill]] }
  0x2f   : > { %604 = vrot.lane.b32.xlu1 %v5360_v2, %s6424_s27  ;;  %518 = vrot.lane.b32.xlu0 %v5360_v2, %s6426_s15  ;;  %v509_v19 = vld [vmem:[%s6441_s4] sm:$0xff]  ;;  %v512_v22 = vld [vmem:[%s6441_s4 + $0x18] sm:$0xff] }
  0x30   : > { %v687_v26 = vld [vmem:[%s6441_s4 + $0x20] sm:$0xff]  ;;  %v510_v29 = vld [vmem:[%s6441_s4 + $0x8] sm:$0xff]  ;;  %v511_v41 = vld [vmem:[%s6441_s4 + $0x10] sm:$0xff] }
  0x31   : > { %v850_v36 = vld [vmem:[%s6441_s4 + $0x28] sm:$0xff]  ;;  %v1024_v48 = vld [vmem:[%s6441_s4 + $0x30] sm:$0xff]  ;;  %v1112_v53 = vld [vmem:[%s6441_s4 + $0x38] sm:$0xff] }
  0x32   : > { %v1200_v60 = vld [vmem:[%s6441_s4 + $0x40] sm:$0xff]  ;;  %s4935_s4 = sshll.u32 %s5351_s24, 4  ;;  %s4936_s4 = int_to_ptr.vmem [resolvable:$true] %s4935_s4 }
  0x33   : > { %606 = vrot.lane.b32.xlu1 %v5368_v4, %s6424_s27  ;;  %520 = vrot.lane.b32.xlu0 %v5368_v4, %s6426_s15 }
  0x37   : > { %766 = vrot.lane.b32.xlu1 %v5368_v4, %s6414_s22  ;;  %764 = vrot.lane.b32.xlu0 %v5360_v2, %s6414_s22 }
  0x3b   : > { %856 = vrot.lane.b32.xlu1 %v5368_v4, %s6422_s26  ;;  %762 = vrot.lane.b32.xlu0 %v5354_v1, %s6414_s22 }
  0x3f   : > { %941 = vrot.lane.b32.xlu1 %v5360_v2, %s6412_s28  ;;  %858 = vrot.lane.b32.xlu0 %v5382_v5, %s6422_s26 }
  0x43   : > { %854 = vrot.lane.b32.xlu1 %v5360_v2, %s6422_s26  ;;  %943 = vrot.lane.b32.xlu0 %v5368_v4, %s6412_s28 }
  0x47   : > { %1027 = vrot.lane.b32.xlu1 %v5368_v4, %s6416_s18  ;;  %939 = vrot.lane.b32.xlu0 %v5354_v1, %s6412_s28 }
  0x4b   : > { %1115 = vrot.lane.b32.xlu1 %v5368_v4, %s6420_s20  ;;  %1029 = vrot.lane.b32.xlu0 %v5382_v5, %s6416_s18 }
  0x4f   : > { %1025 = vrot.lane.b32.xlu1 %v5360_v2, %s6416_s18  ;;  %1117 = vrot.lane.b32.xlu0 %v5382_v5, %s6420_s20 }
  0x53   : > { %1203 = vrot.lane.b32.xlu1 %v5368_v4, %s6418_s21  ;;  %1113 = vrot.lane.b32.xlu0 %v5360_v2, %s6420_s20 }
  0x57   : > { %1205 = vrot.lane.b32.xlu0 %v5382_v5, %s6418_s21  ;;  %1340 = vrot.lane.b32.xlu1 %v5409_v6, %s6426_s15 }
  0x5b   : > { %1342 = vrot.lane.b32.xlu0 %v5416_v7, %s6426_s15  ;;  %1201 = vrot.lane.b32.xlu1 %v5360_v2, %s6418_s21 }
  0x5f   : > { %1338 = vrot.lane.b32.xlu0 %v5354_v1, %s6426_s15  ;;  %1424 = vrot.lane.b32.xlu1 %v5409_v6, %s6424_s27 }
  0x63   : > { %1426 = vrot.lane.b32.xlu0 %v5416_v7, %s6424_s27  ;;  %1422 = vrot.lane.b32.xlu1 %v5354_v1, %s6424_s27 }
  0x67   : > { %1583 = vrot.lane.b32.xlu0 %v5409_v6, %s6414_s22  ;;  %1585 = vrot.lane.b32.xlu1 %v5416_v7, %s6414_s22 }
  0x6b   : > { %1674 = vrot.lane.b32.xlu0 %v5416_v7, %s6422_s26  ;;  %1676 = vrot.lane.b32.xlu1 %v5382_v5, %s6422_s26 }
  0x6f   : > { %1581 = vrot.lane.b32.xlu0 %v5354_v1, %s6414_s22  ;;  %1672 = vrot.lane.b32.xlu1 %v5409_v6, %s6422_s26  ;;  %s6444_s22 = smov 111  }
  0x73   : > { %1758 = vrot.lane.b32.xlu0 %v5409_v6, %s6412_s28  ;;  %1760 = vrot.lane.b32.xlu1 %v5416_v7, %s6412_s28 }
  0x77   : > { %1843 = vrot.lane.b32.xlu0 %v5416_v7, %s6416_s18  ;;  %1845 = vrot.lane.b32.xlu1 %v5382_v5, %s6416_s18 }
  0x7b   : > { %1756 = vrot.lane.b32.xlu0 %v5354_v1, %s6412_s28  ;;  %1841 = vrot.lane.b32.xlu1 %v5409_v6, %s6416_s18  ;;  %s6445_s28 = smov 15  }
  0x7f   : > { %1930 = vrot.lane.b32.xlu0 %v5416_v7, %s6420_s20  ;;  %1932 = vrot.lane.b32.xlu1 %v5382_v5, %s6420_s20 }
  0x83   : > { %2017 = vrot.lane.b32.xlu0 %v5416_v7, %s6418_s21  ;;  %2019 = vrot.lane.b32.xlu1 %v5382_v5, %s6418_s21 }
  0x87   : > { %1928 = vrot.lane.b32.xlu0 %v5409_v6, %s6420_s20  ;;  %2015 = vrot.lane.b32.xlu1 %v5409_v6, %s6418_s21  ;;  %s6442_s21 = smov 113  }
  0x8b   : > { %1321 = vperm.xlu1 %5138, %v1318_v9   ;;  %2112 = vperm.xlu0 %5137, %v2109_v10   ;;  %v1506_v10 = vld [vmem:[%s6398_s6 + $0x20] sm:$0xff] }
  0x8f   : > { %2137 = vrot.lane.b32.xlu0 %v5354_v1, %s6426_s15 }
  0x93   : > { %2231 = vrot.lane.b32.xlu0 %v5354_v1, %s6424_s27 }
  0x9d   : > { %v603_v11 = vpop.permute.xlu1 %602  ;;  %v517_v12 = vpop.permute.xlu0 %516 }
  0xa1   : > { %v605_v13 = vpop.permute.xlu1 %604  ;;  %v519_v14 = vpop.permute.xlu0 %518 }
  0xa2   : > { %v523_v20 = vsel %vm522_vm0, %v517_v12, %v519_v14  ;;  %v609_v21 = vsel %vm608_vm1, %v603_v11, %v605_v13 }
  0xa5   : > { %v607_v15 = vpop.permute.xlu1 %606  ;;  %v521_v16 = vpop.permute.xlu0 %520 }
  0xa6   : > { %v524_v17 = vsel %vm522_vm0, %v519_v14, %v521_v16  ;;  %v610_v18 = vsel %vm608_vm1, %v605_v13, %v607_v15 }
  0xa7   : > { %561 = vmatprep.subr.mxu0 %v524_v17  ;;  %646 = vmatprep.subr.mxu1 %v610_v18 }
  0xa8   : > { %562 = vmatpush1.msra.mxu0 %v523_v20  ;;  %647 = vmatpush1.msra.mxu1 %v609_v21  ;;  %v1668_v20 = vld [vmem:[%s6398_s6 + $0x28] sm:$0xff] }
  0xa9   : > { %v767_v23 = vpop.permute.xlu1 %766  ;;  %v765_v24 = vpop.permute.xlu0 %764  ;;  %5017 = vmatmul.mubr.msk.f32.vlgmr.msra.gmra.mxu1 %vm527_vm2, %v509_v19  ;;  %721 = vmatprep.subr.mxu0 %v5368_v4  ;;  %v1332_v21 = vld [vmem:[%s6398_s6 + $0x8] sm:$0xff] }
  0xaa   : > { %v770_v25 = vsel %vm768_vm3, %v765_v24, %v767_v23  ;;  %5016 = vmatmul.mubr.msk.f32.vlgmr.msra.gmra.mxu0 %vm527_vm2, %v512_v22  ;;  %840 = vmatprep.mubr.f32.mxu1 %v5206_v3 }
  0xab   : > { %806 = vmatprep.subr.mxu1 %v770_v25  ;;  %722 = vmatpush1.msra.mxu0 %v5360_v2  ;;  %v1334_v2 = vld [vmem:[%s6398_s6 + $0x18] sm:$0xff] }
  0xac   : > { %755 = vmatprep.mubr.f32.mxu0 %v5206_v3 }
  0xad   : > { %v857_v27 = vpop.permute.xlu1 %856  ;;  %v763_v28 = vpop.permute.xlu0 %762 }
  0xae   : > { %v769_v30 = vsel %vm768_vm3, %v763_v28, %v765_v24  ;;  %5018 = vmatmul.mubr.msk.f32.vlgmr.msra.gmra.mxu0 %vm527_vm2, %v687_v26 }
  0xaf   : > { %807 = vmatpush1.msra.mxu1 %v769_v30  ;;  %932 = vmatprep.mubr.f32.mxu0 %v5206_v3 }
  0xb0   : > { %5019 = vmatmul.mubr.msk.f32.vlgmr.msra.gmra.mxu1 %vm527_vm2, %v510_v29 }
  0xb1   : > { %v942_v31 = vpop.permute.xlu1 %941  ;;  %v859_v32 = vpop.permute.xlu0 %858  ;;  %1017 = vmatprep.mubr.f32.mxu1 %v5206_v3 }
  0xb2   : > { %v862_v33 = vsel %vm860_vm4, %v857_v27, %v859_v32  ;;  %v1840_v32 = vld [vmem:[%s6398_s6 + $0x30] sm:$0xff] }
  0xb3   : > { %898 = vmatprep.subr.mxu0 %v862_v33  ;;  %v1333_v33 = vld [vmem:[%s6398_s6 + $0x10] sm:$0xff] }
  0xb5   : > { %v855_v34 = vpop.permute.xlu1 %854  ;;  %v944_v35 = vpop.permute.xlu0 %943 }
  0xb6   : > { %v861_v37 = vsel %vm860_vm4, %v855_v34, %v857_v27  ;;  %v947_v38 = vsel %vm945_vm5, %v942_v31, %v944_v35 }
  0xb7   : > { %899 = vmatpush1.msra.mxu0 %v861_v37  ;;  %983 = vmatprep.subr.mxu1 %v947_v38 }
  0xb8   : > { %5020 = vmatmul.mubr.msk.f32.vlgmr.msra.gmra.mxu0 %vm527_vm2, %v850_v36  ;;  %v2499_v36 = vld [vmem:[#allocation2 + $0x38] sm:$0xff] }
  0xb9   : > { %v1028_v39 = vpop.permute.xlu1 %1027  ;;  %v940_v40 = vpop.permute.xlu0 %939  ;;  %1103 = vmatprep.mubr.f32.mxu0 %v5206_v3  ;;  %2517 = vrot.lane.b32.xlu0 %v2499_v36, %s6422_s26 }
  0xba   : > { %v946_v42 = vsel %vm945_vm5, %v940_v40, %v942_v31 }
  0xbb   : > { %984 = vmatpush1.msra.mxu1 %v946_v42 }
  0xbc   : > { %5021 = vmatmul.mubr.msk.f32.vlgmr.msra.gmra.mxu1 %vm527_vm2, %v511_v41 }
  0xbd   : > { %v1116_v43 = vpop.permute.xlu1 %1115  ;;  %v1030_v44 = vpop.permute.xlu0 %1029  ;;  %1191 = vmatprep.mubr.f32.mxu1 %v5206_v3  ;;  %2511 = vrot.lane.b32.xlu0 %v5382_v5, %s6422_s26  ;;  %s6449_s26 = smov 127  }
  0xbe   : > { %v1033_v45 = vsel %vm1031_vm6, %v1028_v39, %v1030_v44 }
  0xbf   : > { %1069 = vmatprep.subr.mxu0 %v1033_v45 }
  0xc1   : > { %v1026_v46 = vpop.permute.xlu1 %1025  ;;  %v1118_v47 = vpop.permute.xlu0 %1117  ;;  %2706 = vrot.lane.b32.xlu0 %v2499_v36, %s6442_s21 }
  0xc2   : > { %v1032_v49 = vsel %vm1031_vm6, %v1026_v46, %v1028_v39  ;;  %v1121_v50 = vsel %vm1119_vm7, %v1116_v43, %v1118_v47  ;;  %v1927_v46 = vld [vmem:[%s6398_s6 + $0x38] sm:$0xff]  ;;  %v2014_v47 = vld [vmem:[%s6398_s6 + $0x40] sm:$0xff] }
  0xc3   : > { %1070 = vmatpush1.msra.mxu0 %v1032_v49  ;;  %1157 = vmatprep.subr.mxu1 %v1121_v50 }
  0xc4   : > { %5022 = vmatmul.mubr.msk.f32.vlgmr.msra.gmra.mxu0 %vm527_vm2, %v1024_v48 }
  0xc5   : > { %v1204_v51 = vpop.permute.xlu1 %1203  ;;  %v1114_v52 = vpop.permute.xlu0 %1113  ;;  %1279 = vmatprep.mubr.f32.mxu0 %v5206_v3  ;;  %2700 = vrot.lane.b32.xlu0 %v5382_v5, %s6442_s21 }
  0xc6   : > { %v1120_v54 = vsel %vm1119_vm7, %v1114_v52, %v1116_v43  ;;  %v2124_v43 = vld [vmem:[#allocation2 + $0x8] sm:$0xff] }
  0xc7   : > { %1158 = vmatpush1.msra.mxu1 %v1120_v54  ;;  %2143 = vrot.lane.b32.xlu1 %v2124_v43, %s6426_s15 }
  0xc8   : > { %5023 = vmatmul.mubr.msk.f32.vlgmr.msra.gmra.mxu1 %vm527_vm2, %v1112_v53 }
  0xc9   : > { %v1206_v55 = vpop.permute.xlu0 %1205  ;;  %v1341_v56 = vpop.permute.xlu1 %1340  ;;  %1415 = vmatprep.mubr.f32.mxu1 %v5206_v3  ;;  %2803 = vrot.lane.b32.xlu0 %v2499_v36, %s6420_s20 }
  0xca   : > { %v1209_v57 = vsel %vm1207_vm8, %v1204_v51, %v1206_v55 }
  0xcb   : > { %1245 = vmatprep.subr.mxu0 %v1209_v57  ;;  %2237 = vrot.lane.b32.xlu1 %v2124_v43, %s6424_s27  ;;  %v1289_v57 = vlaneseq  ;;  %s6448_s27 = smov 17  }
  0xcd   : > { %v1343_v58 = vpop.permute.xlu0 %1342  ;;  %v1202_v59 = vpop.permute.xlu1 %1201  ;;  %2900 = vrot.lane.b32.xlu0 %v2499_v36, %s6444_s22 }
  0xce   : > { %v1208_v61 = vsel %vm1207_vm8, %v1202_v59, %v1204_v51  ;;  %v1345_v62 = vsel %vm522_vm0, %v1341_v56, %v1343_v58 }
  0xcf   : > { %1246 = vmatpush1.msra.mxu0 %v1208_v61  ;;  %1381 = vmatprep.subr.mxu1 %v1345_v62 }
  0xd0   : > { %5024 = vmatmul.mubr.msk.f32.vlgmr.msra.gmra.mxu0 %vm527_vm2, %v1200_v60  ;;  %2406 = vrot.lane.b32.xlu1 %v2124_v43, %s6443_s25  ;;  %v1290_v60 = vshrl.u32 %v1289_v57, 7 }
  0xd1   : > { %v1339_v63 = vpop.permute.xlu0 %1338  ;;  %v1425_v0 = vpop.permute.xlu1 %1424  ;;  %1499 = vmatprep.mubr.f32.mxu0 %v5206_v3  ;;  %2797 = vrot.lane.b32.xlu0 %v5382_v5, %s6420_s20  ;;  %s6450_s20 = smov 112  }
  0xd2   : > { %v1344_v4 = vsel %vm522_vm0, %v1339_v63, %v1341_v56 }
  0xd3   : > { %1382 = vmatpush1.msra.mxu1 %v1344_v4 }
  0xd4   : > { %1540 = vmatprep.subr.mxu1 %v5416_v7  ;;  %5025 = vmatmul.mubr.msk.f32.vlgmr.msra.gmra.mxu1 %vm527_vm2, %v1334_v2  ;;  %v1331_v7 = vld [vmem:[%s6398_s6] sm:$0xff] }
  0xd5   : > { %v1427_v8 = vpop.permute.xlu0 %1426  ;;  %v1423_v9 = vpop.permute.xlu1 %1422  ;;  %1541 = vmatpush1.msra.mxu1 %v5409_v6  ;;  %1574 = vmatprep.mubr.f32.mxu1 %v5206_v3  ;;  %v498_v2 = vld [vmem:[%s6446_s2] sm:$0x3] }
  0xd6   : > { %v1428_v11 = vsel %vm608_vm1, %v1423_v9, %v1425_v0  ;;  %v1429_v12 = vsel %vm608_vm1, %v1425_v0, %v1427_v8  ;;  %2400 = vrot.lane.b32.xlu1 %v5354_v1, %s6443_s25  ;;  %v1291_v0 = vsub.s32 0, %v1290_v60 }
  0xd7   : > { %1465 = vmatprep.subr.mxu0 %v1429_v12  ;;  %v1295_v12 = vsub.s32 1, %v1290_v60 }
  0xd8   : > { %1466 = vmatpush1.msra.mxu0 %v1428_v11  ;;  %5027 = vmatmul.mubr.msk.f32.vlgmr.msra.gmra.mxu1 %vm527_vm2, %v1506_v10  ;;  %v5623_v10 = vrot.slane %v498_v2, %v1291_v0 }
  0xd9   : > { %v1584_v13 = vpop.permute.xlu0 %1583  ;;  %v1586_v6 = vpop.permute.xlu1 %1585  ;;  %5026 = vmatmul.mubr.msk.f32.vlgmr.msra.gmra.mxu0 %vm527_vm2, %v1331_v7  ;;  %1749 = vmatprep.mubr.f32.mxu1 %v5206_v3 }
  0xda   : > { %v1588_v14 = vsel %vm768_vm3, %v1584_v13, %v1586_v6  ;;  %1658 = vmatprep.mubr.f32.mxu0 %v5206_v3  ;;  %2607 = vrot.lane.b32.xlu1 %v2124_v43, %s6445_s28 }
  0xdb   : > { %1624 = vmatprep.subr.mxu0 %v1588_v14 }
  0xdd   : > { %v1675_v15 = vpop.permute.xlu0 %1674  ;;  %v1677_v16 = vpop.permute.xlu1 %1676 }
  0xde   : > { %v1679_v17 = vsel %vm860_vm4, %v1675_v15, %v1677_v16  ;;  %2601 = vrot.lane.b32.xlu1 %v5354_v1, %s6445_s28 }
  0xdf   : > { %1715 = vmatprep.subr.mxu1 %v1679_v17 }
  0xe1   : > { %v1582_v18 = vpop.permute.xlu0 %1581  ;;  %v1673_v19 = vpop.permute.xlu1 %1672 }
  0xe2   : > { %v1587_v22 = vsel %vm768_vm3, %v1582_v18, %v1584_v13  ;;  %v1678_v23 = vsel %vm860_vm4, %v1673_v19, %v1675_v15  ;;  %v499_v13 = vld [vmem:[%s6447_s3] sm:$0x3]  ;;  %v5631_v19 = vrot.slane %v498_v2, %v1295_v12  ;;  %s5086_s3 = sshll.u32 %s5311_s17, 8  ;;  %s5214_s17 = smov [#allocation3]  }
  0xe3   : > { %1625 = vmatpush1.msra.mxu0 %v1587_v22  ;;  %1716 = vmatpush1.msra.mxu1 %v1678_v23  ;;  %v5629_v18 = vrot.slane %v499_v13, %v1291_v0 }
  0xe4   : > { %5029 = vmatmul.mubr.msk.f32.vlgmr.msra.gmra.mxu1 %vm527_vm2, %v1668_v20  ;;  %5028 = vmatmul.mubr.msk.f32.vlgmr.msra.gmra.mxu0 %vm527_vm2, %v1332_v21 }
  0xe5   : > { %v1759_v24 = vpop.permute.xlu0 %1758  ;;  %v1761_v25 = vpop.permute.xlu1 %1760  ;;  %1918 = vmatprep.mubr.f32.mxu1 %v5206_v3  ;;  %1833 = vmatprep.mubr.f32.mxu0 %v5206_v3 }
  0xe6   : > { %v1763_v26 = vsel %vm945_vm5, %v1759_v24, %v1761_v25 }
  0xe7   : > { %1799 = vmatprep.subr.mxu0 %v1763_v26 }
  0xe9   : > { %v1844_v27 = vpop.permute.xlu0 %1843  ;;  %v1846_v28 = vpop.permute.xlu1 %1845 }
  0xea   : > { %v1848_v29 = vsel %vm1031_vm6, %v1844_v27, %v1846_v28 }
  0xeb   : > { %1884 = vmatprep.subr.mxu1 %v1848_v29  ;;  %v5634_v29 = vrot.slane %v499_v13, %v1295_v12 }
  0xed   : > { %v1757_v30 = vpop.permute.xlu0 %1756  ;;  %v1842_v31 = vpop.permute.xlu1 %1841 }
  0xee   : > { %v1762_v34 = vsel %vm945_vm5, %v1757_v30, %v1759_v24  ;;  %v1847_v35 = vsel %vm1031_vm6, %v1842_v31, %v1844_v27 }
  0xef   : > { %1800 = vmatpush1.msra.mxu0 %v1762_v34  ;;  %1885 = vmatpush1.msra.mxu1 %v1847_v35 }
  0xf0   : > { %5031 = vmatmul.mubr.msk.f32.vlgmr.msra.gmra.mxu1 %vm527_vm2, %v1840_v32  ;;  %5030 = vmatmul.mubr.msk.f32.vlgmr.msra.gmra.mxu0 %vm527_vm2, %v1333_v33 }
  0xf1   : > { %v1931_v37 = vpop.permute.xlu0 %1930  ;;  %v1933_v38 = vpop.permute.xlu1 %1932  ;;  %2005 = vmatprep.mubr.f32.mxu0 %v5206_v3  ;;  %2092 = vmatprep.mubr.f32.mxu1 %v5206_v3 }
  0xf2   : > { %v1935_v39 = vsel %vm1119_vm7, %v1931_v37, %v1933_v38 }
  0xf3   : > { %1971 = vmatprep.subr.mxu0 %v1935_v39 }
  0xf5   : > { %v2018_v40 = vpop.permute.xlu0 %2017  ;;  %v2020_v41 = vpop.permute.xlu1 %2019 }
  0xf6   : > { %v2022_v42 = vsel %vm1207_vm8, %v2018_v40, %v2020_v41 }
  0xf7   : > { %2058 = vmatprep.subr.mxu1 %v2022_v42 }
  0xf9   : > { %v1929_v44 = vpop.permute.xlu0 %1928  ;;  %v2016_v45 = vpop.permute.xlu1 %2015 }
  0xfa   : > { %v1934_v48 = vsel %vm1119_vm7, %v1929_v44, %v1931_v37  ;;  %v2021_v49 = vsel %vm1207_vm8, %v2016_v45, %v2018_v40 }
  0xfb   : > { %1972 = vmatpush1.msra.mxu0 %v1934_v48  ;;  %2059 = vmatpush1.msra.mxu1 %v2021_v49 }
  0xfc   : > { %5032 = vmatmul.mubr.msk.f32.vlgmr.msra.gmra.mxu0 %vm527_vm2, %v1927_v46  ;;  %5033 = vmatmul.mubr.msk.f32.vlgmr.msra.gmra.mxu1 %vm527_vm2, %v2014_v47 }
  0xfd   : > { %2224 = vmatprep.mubr.f32.mxu0 %v5206_v3  ;;  %2318 = vmatprep.mubr.f32.mxu1 %v5206_v3 }
 0x106   : > { %v1322_v30 = vpop.permute.xlu1 %1321  ;;  %v2113_v2 = vpop.permute.xlu0 %2112 }
 0x169   : > { %v682_v52 = vpop.f32.mrf.mxu1 }
 0x16a   : > { %v597_v50 = vpop.f32.mrf.mxu0 }
 0x16b   : > { %v684_v53 = vpop.f32.mrf.mxu1  ;;  %v683_v63 = vadd.f32 %v682_v52, %v597_v50 }
 0x16c   : > { %v599_v51 = vpop.f32.mrf.mxu0 }
 0x16d   : > { %v685_v6 = vadd.f32 %v684_v53, %v599_v51 }
 0x16e   : > { %v757_v54 = vpop.f32.mrf.mxu0 }
 0x170   : > { %v759_v55 = vpop.f32.mrf.mxu0  ;;  %v842_v56 = vpop.f32.mrf.mxu1 }
 0x171   : > { %v843_v8 = vadd.f32 %v842_v56, %v757_v54 }
 0x172   : > { %v844_v58 = vpop.f32.mrf.mxu1 }
 0x173   : > { %v845_v21 = vadd.f32 %v844_v58, %v759_v55 }
 0x178   : > { %v934_v59 = vpop.f32.mrf.mxu0 }
 0x17a   : > { %v936_v61 = vpop.f32.mrf.mxu0 }
 0x17c   : > { %v1019_v62 = vpop.f32.mrf.mxu1 }
 0x17d   : > { %v1020_v14 = vadd.f32 %v1019_v62, %v934_v59 }
 0x17e   : > { %v1021_v1 = vpop.f32.mrf.mxu1 }
 0x17f   : > { %v1022_v17 = vadd.f32 %v1021_v1, %v936_v61 }
 0x184   : > { %v1105_v4 = vpop.f32.mrf.mxu0 }
 0x185   : > { %v1110_v9 = vadd.f32 %v1105_v4, %v683_v63 }
 0x186   : > { %v1107_v11 = vpop.f32.mrf.mxu0 }
 0x187   : > { %v1299_v15 = vmul.f32 %v5623_v10, %v1110_v9  ;;  %v1111_v22 = vadd.f32 %v1107_v11, %v685_v6 }
 0x188   : > { %v1193_v7 = vpop.f32.mrf.mxu1 }
 0x189   : > { %v1198_v16 = vadd.f32 %v1193_v7, %v843_v8  ;;  %v1300_v31 = vmul.f32 %v5631_v19, %v1111_v22 }
 0x18a   : > { %v1195_v25 = vpop.f32.mrf.mxu1 }
 0x18b   : > { %v1301_v23 = vadd.f32 %v1299_v15, %v1198_v16  ;;  %v1199_v32 = vadd.f32 %v1195_v25, %v845_v21  ;;  %v2138_v21 = vpop.permute.xlu0 %2137 }
 0x18d   : > { %v1302_v36 = vadd.f32 %v1300_v31, %v1199_v32 }
 0x18f   : > { %v2232_v22 = vpop.permute.xlu0 %2231 }
 0x190   : > { %v1281_v20 = vpop.f32.mrf.mxu0 }
 0x191   : > { %v1286_v24 = vadd.f32 %v1281_v20, %v1020_v14 }
 0x192   : > { %v1283_v26 = vpop.f32.mrf.mxu0 }
 0x193   : > { %v1314_v27 = vmul.f32 %v5629_v18, %v1286_v24  ;;  %v1287_v28 = vadd.f32 %v1283_v26, %v1022_v17  ;;  %v2994_v24 = vld [vmem:[%s6401_s9] sm:$0xff]  ;;  %v5719_v25 = vpop.permute.xlu0 %2517 }
 0x194   : > { %v1417_v38 = vpop.f32.mrf.mxu1 }
 0x195   : > { %v1316_v33 = vadd.f32 %v1314_v27, %v1301_v23  ;;  %v1315_v34 = vmul.f32 %v5634_v29, %v1287_v28  ;;  %v2144_v23 = vpop.permute.xlu1 %2143 }
 0x196   : > { %v1419_v40 = vpop.f32.mrf.mxu1 }
 0x197   : > { %v5638_v35 = vadd.f32 %v1322_v30, %v1316_v33  ;;  %v1317_v37 = vadd.f32 %v1315_v34, %v1302_v36 }
 0x198   : > { %v1576_v41 = vpop.f32.mrf.mxu1 }
 0x199   : > { %2402 = vrot.lane.b32.xlu1 %v5638_v35, %s6443_s25  ;;  %2139 = vrot.lane.b32.xlu0 %v5638_v35, %s6426_s15  ;;  %v5648_v39 = vadd.f32 %v1322_v30, %v1317_v37  ;;  %v1501_v42 = vpop.f32.mrf.mxu0  ;;  %v2238_v26 = vpop.permute.xlu1 %2237 }
 0x19a   : > { %v1578_v43 = vpop.f32.mrf.mxu1  ;;  %v1502_v51 = vadd.f32 %v1501_v42, %v1417_v38 }
 0x19b   : > { %v1503_v44 = vpop.f32.mrf.mxu0 }
 0x19c   : > { %v1504_v62 = vadd.f32 %v1503_v44, %v1419_v40 }
 0x19d   : > { %2603 = vrot.lane.b32.xlu1 %v5638_v35, %s6445_s28  ;;  %2233 = vrot.lane.b32.xlu0 %v5638_v35, %s6448_s27  ;;  %v5723_v27 = vpop.permute.xlu1 %2406 }
 0x1a1   : > { %2141 = vrot.lane.b32.xlu1 %v5648_v39, %s6426_s15  ;;  %2507 = vrot.lane.b32.xlu0 %v5638_v35, %s6449_s26  ;;  %v5727_v30 = vpop.permute.xlu1 %2400 }
 0x1a4   : > { %v1751_v45 = vpop.f32.mrf.mxu1  ;;  %v1660_v46 = vpop.f32.mrf.mxu0 }
 0x1a5   : > { %2235 = vrot.lane.b32.xlu1 %v5648_v39, %s6448_s27  ;;  %2696 = vrot.lane.b32.xlu0 %v5638_v35, %s6442_s21  ;;  %v1661_v55 = vadd.f32 %v1660_v46, %v1576_v41  ;;  %v5731_v32 = vpop.permute.xlu1 %2607 }
 0x1a6   : > { %v1753_v47 = vpop.f32.mrf.mxu1  ;;  %v1662_v48 = vpop.f32.mrf.mxu0 }
 0x1a7   : > { %v1663_v8 = vadd.f32 %v1662_v48, %v1578_v43 }
 0x1a9   : > { %2509 = vrot.lane.b32.xlu1 %v5648_v39, %s6449_s26  ;;  %2404 = vrot.lane.b32.xlu0 %v5648_v39, %s6443_s25  ;;  %v5735_v34 = vpop.permute.xlu1 %2601 }
 0x1ad   : > { %2698 = vrot.lane.b32.xlu1 %v5648_v39, %s6442_s21  ;;  %2605 = vrot.lane.b32.xlu0 %v5648_v39, %s6445_s28 }
 0x1b0   : > { %v1920_v49 = vpop.f32.mrf.mxu1  ;;  %v1835_v50 = vpop.f32.mrf.mxu0 }
 0x1b1   : > { %2795 = vrot.lane.b32.xlu1 %v5648_v39, %s6450_s20  ;;  %v1925_v52 = vadd.f32 %v1920_v49, %v1502_v51  ;;  %v1836_v56 = vadd.f32 %v1835_v50, %v1751_v45 }
 0x1b2   : > { %v1922_v53 = vpop.f32.mrf.mxu1  ;;  %v1837_v54 = vpop.f32.mrf.mxu0 }
 0x1b3   : > { %v2101_v59 = vmul.f32 %v1925_v52, %v5623_v10  ;;  %v1926_v9 = vadd.f32 %v1922_v53, %v1504_v62  ;;  %v1838_v11 = vadd.f32 %v1837_v54, %v1753_v47 }
 0x1b5   : > { %2892 = vrot.lane.b32.xlu1 %v5648_v39, %s6444_s22  ;;  %v2102_v14 = vmul.f32 %v1926_v9, %v5631_v19 }
 0x1bc   : > { %v2007_v57 = vpop.f32.mrf.mxu0  ;;  %v2094_v58 = vpop.f32.mrf.mxu1 }
 0x1bd   : > { %v2012_v60 = vadd.f32 %v2007_v57, %v1661_v55  ;;  %v2099_v61 = vadd.f32 %v2094_v58, %v1836_v56 }
 0x1be   : > { %v2009_v1 = vpop.f32.mrf.mxu0  ;;  %v2096_v4 = vpop.f32.mrf.mxu1 }
 0x1bf   : > { %v2103_v63 = vadd.f32 %v2101_v59, %v2012_v60  ;;  %v2105_v0 = vmul.f32 %v2099_v61, %v5629_v18  ;;  %v2013_v7 = vadd.f32 %v2009_v1, %v1663_v8  ;;  %v2100_v13 = vadd.f32 %v2096_v4, %v1838_v11 }
 0x1c1   : > { %v2107_v12 = vadd.f32 %v2105_v0, %v2103_v63  ;;  %v2104_v15 = vadd.f32 %v2102_v14, %v2013_v7  ;;  %v2106_v16 = vmul.f32 %v2100_v13, %v5634_v29  ;;  %v2130_v0 = vld [vmem:[%s6400_s8 + $0x18] sm:$0xff]  ;;  %v2127_v14 = vld [vmem:[%s6400_s8] sm:$0xff] }
 0x1c3   : > { %v5672_v6 = vadd.f32 %v2113_v2, %v2107_v12  ;;  %v2108_v17 = vadd.f32 %v2106_v16, %v2104_v15  ;;  %v2325_v15 = vld [vmem:[%s6400_s8 + $0x20] sm:$0xff] }
 0x1c5   : > { %2145 = vrot.lane.b32.xlu1 %v5672_v6, %s6426_s15  ;;  %2513 = vrot.lane.b32.xlu0 %v5672_v6, %s6449_s26  ;;  %v5688_v20 = vadd.f32 %v2113_v2, %v2108_v17 }
 0x1c9   : > { %2239 = vrot.lane.b32.xlu1 %v5672_v6, %s6448_s27  ;;  %2702 = vrot.lane.b32.xlu0 %v5672_v6, %s6442_s21 }
 0x1cd   : > { %2408 = vrot.lane.b32.xlu1 %v5672_v6, %s6443_s25  ;;  %2896 = vrot.lane.b32.xlu0 %v5672_v6, %s6444_s22 }
 0x1d1   : > { %2609 = vrot.lane.b32.xlu1 %v5672_v6, %s6445_s28  ;;  %2147 = vrot.lane.b32.xlu0 %v5688_v20, %s6426_s15 }
 0x1d5   : > { %2799 = vrot.lane.b32.xlu1 %v5672_v6, %s6450_s20  ;;  %2241 = vrot.lane.b32.xlu0 %v5688_v20, %s6448_s27 }
 0x1d9   : > { %2515 = vrot.lane.b32.xlu1 %v5688_v20, %s6449_s26  ;;  %2410 = vrot.lane.b32.xlu0 %v5688_v20, %s6443_s25 }
 0x1dd   : > { %2704 = vrot.lane.b32.xlu1 %v5688_v20, %s6442_s21  ;;  %2611 = vrot.lane.b32.xlu0 %v5688_v20, %s6445_s28 }
 0x1e1   : > { %2801 = vrot.lane.b32.xlu1 %v5688_v20, %s6450_s20  ;;  %2894 = vrot.lane.b32.xlu0 %v5382_v5, %s6444_s22  ;;  %v5721_v5 = vpop.permute.xlu0 %2511 }
 0x1e5   : > { %2898 = vrot.lane.b32.xlu1 %v5688_v20, %s6444_s22  ;;  %2890 = vrot.lane.b32.xlu0 %v5638_v35, %s6444_s22  ;;  %v5725_v28 = vpop.permute.xlu0 %2706 }
 0x1e9   : > { %2793 = vrot.lane.b32.xlu1 %v5638_v35, %s6450_s20  ;;  %v5729_v31 = vpop.permute.xlu0 %2700 }
 0x1ed   : > { %2997 = vperm.xlu1 %5138, %v2994_v24   ;;  %v5733_v33 = vpop.permute.xlu0 %2803  ;;  %v2128_v24 = vld [vmem:[%s6400_s8 + $0x8] sm:$0xff] }
 0x1f1   : > { %v5737_v36 = vpop.permute.xlu0 %2900 }
 0x1f5   : > { %v5741_v38 = vpop.permute.xlu0 %2797 }
 0x20b   : > { %v5739_v37 = vpop.permute.xlu1 %2402  ;;  %v2140_v41 = vpop.permute.xlu0 %2139 }
 0x20c   : > { %v2149_v4 = vsel %vm522_vm0, %v2138_v21, %v2140_v41 }
 0x20f   : > { %v5743_v40 = vpop.permute.xlu1 %2603  ;;  %v2234_v43 = vpop.permute.xlu0 %2233 }
 0x210   : > { %v2243_v13 = vsel %vm608_vm1, %v2232_v22, %v2234_v43 }
 0x213   : > { %v2142_v42 = vpop.permute.xlu1 %2141  ;;  %v5745_v45 = vpop.permute.xlu0 %2507 }
 0x214   : > { %v2150_v63 = vsel %vm522_vm0, %v2140_v41, %v2142_v42 }
 0x217   : > { %v2236_v44 = vpop.permute.xlu1 %2235  ;;  %v5749_v47 = vpop.permute.xlu0 %2696 }
 0x218   : > { %v2244_v11 = vsel %vm608_vm1, %v2234_v43, %v2236_v44  ;;  %v2613_v44 = vsel %vm945_vm5, %v5735_v34, %v5743_v40 }
 0x21b   : > { %v5747_v46 = vpop.permute.xlu1 %2509  ;;  %v2405_v49 = vpop.permute.xlu0 %2404 }
 0x21c   : > { %v2413_v22 = vsel %vm768_vm3, %v5739_v37, %v2405_v49 }
 0x21f   : > { %v5751_v48 = vpop.permute.xlu1 %2698  ;;  %v5755_v51 = vpop.permute.xlu0 %2605 }
 0x220   : > { %v2709_v43 = vsel %vm1031_vm6, %v5751_v48, %v5729_v31  ;;  %v2708_v31 = vsel %vm1031_vm6, %v5749_v47, %v5751_v48 }
 0x223   : > { %v5753_v50 = vpop.permute.xlu1 %2795 }
 0x227   : > { %v5757_v52 = vpop.permute.xlu1 %2892 }
 0x237   : > { %v2146_v53 = vpop.permute.xlu1 %2145  ;;  %v2514_v54 = vpop.permute.xlu0 %2513 }
 0x238   : > { %v2151_v62 = vsel %vm522_vm0, %v2144_v23, %v2146_v53  ;;  %v2412_v23 = vsel %vm768_vm3, %v5727_v30, %v5739_v37 }
 0x23b   : > { %v2240_v55 = vpop.permute.xlu1 %2239  ;;  %v2703_v56 = vpop.permute.xlu0 %2702 }
 0x23c   : > { %v2245_v9 = vsel %vm608_vm1, %v2238_v26, %v2240_v55  ;;  %v2519_v26 = vsel %vm860_vm4, %v5745_v45, %v5747_v46  ;;  %v2695_v45 = vld [vmem:[%s6400_s8 + $0x30] sm:$0xff] }
 0x23f   : > { %v2409_v57 = vpop.permute.xlu1 %2408  ;;  %v5759_v58 = vpop.permute.xlu0 %2896 }
 0x243   : > { %v5761_v59 = vpop.permute.xlu1 %2609  ;;  %v2148_v60 = vpop.permute.xlu0 %2147 }
 0x244   : > { %v2152_v61 = vsel %vm522_vm0, %v2146_v53, %v2148_v60  ;;  %v2615_v42 = vsel %vm945_vm5, %v5731_v32, %v5761_v59  ;;  %v2129_v32 = vld [vmem:[%s6400_s8 + $0x10] sm:$0xff] }
 0x245   : > { %2188 = vmatprep.subr.mxu0 %v2152_v61 }
 0x246   : > { %2189 = vmatpush1.msra.mxu0 %v2151_v62 }
 0x247   : > { %v5769_v2 = vpop.permute.xlu1 %2799  ;;  %2190 = vmatprep.subr.mxu0 %v2150_v63  ;;  %v2242_v1 = vpop.permute.xlu0 %2241 }
 0x248   : > { %2191 = vmatpush1.msra.mxu0 %v2149_v4  ;;  %v2246_v8 = vsel %vm608_vm1, %v2240_v55, %v2242_v1  ;;  %v2889_v55 = vld [vmem:[%s6400_s8 + $0x40] sm:$0xff] }
 0x249   : > { %5034 = vmatmul.mubr.msk.f32.vlgmr.msra.gmra.mxu0 %vm768_vm3, %v2130_v0  ;;  %2282 = vmatprep.subr.mxu1 %v2246_v8 }
 0x24a   : > { %2357 = vmatprep.subr.mxu0 %v5688_v20  ;;  %2283 = vmatpush1.msra.mxu1 %v2245_v9  ;;  %v2414_v20 = vsel %vm768_vm3, %v5723_v27, %v2409_v57 }
 0x24b   : > { %2358 = vmatpush1.msra.mxu0 %v5672_v6  ;;  %v2516_v12 = vpop.permute.xlu1 %2515  ;;  %2284 = vmatprep.subr.mxu1 %v2244_v11  ;;  %v2411_v7 = vpop.permute.xlu0 %2410 }
 0x24c   : > { %2359 = vmatprep.subr.mxu0 %v5648_v39  ;;  %2285 = vmatpush1.msra.mxu1 %v2243_v13  ;;  %v2415_v16 = vsel %vm768_vm3, %v2409_v57, %v2411_v7  ;;  %v2522_v6 = vsel %vm860_vm4, %v2516_v12, %v5719_v25  ;;  %v2521_v17 = vsel %vm860_vm4, %v2514_v54, %v2516_v12  ;;  %v2500_v25 = vld [vmem:[%s6400_s8 + $0x28] sm:$0xff] }
 0x24d   : > { %2360 = vmatpush1.msra.mxu0 %v5638_v35  ;;  %2393 = vmatprep.mubr.f32.mxu0 %v5206_v3  ;;  %v2520_v35 = vsel %vm860_vm4, %v5747_v46, %v5721_v5 }
 0x24e   : > { %5035 = vmatmul.mubr.msk.f32.vlgmr.msra.gmra.mxu1 %vm768_vm3, %v2127_v14  ;;  %5036 = vmatmul.mubr.msk.f32.vlgmr.msra.gmra.mxu0 %vm768_vm3, %v2325_v15 }
 0x24f   : > { %2451 = vmatprep.subr.mxu1 %v2415_v16  ;;  %2558 = vmatprep.subr.mxu0 %v2522_v6  ;;  %v2705_v39 = vpop.permute.xlu1 %2704  ;;  %v2612_v21 = vpop.permute.xlu0 %2611 }
 0x250   : > { %2452 = vmatpush1.msra.mxu1 %v2414_v20  ;;  %2559 = vmatpush1.msra.mxu0 %v2521_v17  ;;  %v2616_v5 = vsel %vm945_vm5, %v5761_v59, %v2612_v21  ;;  %v2711_v27 = vsel %vm1031_vm6, %v2705_v39, %v5725_v28  ;;  %v2710_v30 = vsel %vm1031_vm6, %v2703_v56, %v2705_v39 }
 0x251   : > { %2453 = vmatprep.subr.mxu1 %v2413_v22  ;;  %2560 = vmatprep.subr.mxu0 %v2520_v35  ;;  %v2614_v28 = vsel %vm945_vm5, %v5743_v40, %v5755_v51 }
 0x252   : > { %2454 = vmatpush1.msra.mxu1 %v2412_v23  ;;  %2487 = vmatprep.mubr.f32.mxu1 %v5206_v3 }
 0x253   : > { %2561 = vmatpush1.msra.mxu0 %v2519_v26  ;;  %2594 = vmatprep.mubr.f32.mxu0 %v5206_v3  ;;  %v2802_v37 = vpop.permute.xlu1 %2801  ;;  %v2895_v41 = vpop.permute.xlu0 %2894 }
 0x254   : > { %5037 = vmatmul.mubr.msk.f32.vlgmr.msra.gmra.mxu1 %vm768_vm3, %v2128_v24  ;;  %5038 = vmatmul.mubr.msk.f32.vlgmr.msra.gmra.mxu0 %vm768_vm3, %v2500_v25  ;;  %v2808_v49 = vsel %vm1119_vm7, %v2802_v37, %v5733_v33  ;;  %v2807_v40 = vsel %vm1119_vm7, %v5769_v2, %v2802_v37  ;;  %v2903_v53 = vsel %vm1207_vm8, %v5757_v52, %v2895_v41 }
 0x255   : > { %2652 = vmatprep.subr.mxu1 %v2616_v5  ;;  %2747 = vmatprep.subr.mxu0 %v2711_v27 }
 0x256   : > { %2653 = vmatpush1.msra.mxu1 %v2615_v42  ;;  %2748 = vmatpush1.msra.mxu0 %v2710_v30 }
 0x257   : > { %2654 = vmatprep.subr.mxu1 %v2614_v28  ;;  %2749 = vmatprep.subr.mxu0 %v2709_v43  ;;  %v2899_v46 = vpop.permute.xlu1 %2898  ;;  %v2891_v47 = vpop.permute.xlu0 %2890 }
 0x258   : > { %2655 = vmatpush1.msra.mxu1 %v2613_v44  ;;  %2688 = vmatprep.mubr.f32.mxu1 %v5206_v3  ;;  %v2905_v34 = vsel %vm1207_vm8, %v2899_v46, %v5737_v36  ;;  %v2904_v51 = vsel %vm1207_vm8, %v5759_v58, %v2899_v46  ;;  %v2806_v36 = vsel %vm1119_vm7, %v5753_v50, %v5741_v38  ;;  %v2792_v38 = vld [vmem:[%s6400_s8 + $0x38] sm:$0xff]  ;;  %v5890_v44 = vld [vmem:[#allocation2 + $0x10] sm:$0xff] }
 0x259   : > { %2750 = vmatpush1.msra.mxu0 %v2708_v31  ;;  %2783 = vmatprep.mubr.f32.mxu0 %v5206_v3  ;;  %v2902_v54 = vsel %vm1207_vm8, %v2891_v47, %v5757_v52 }
 0x25a   : > { %5039 = vmatmul.mubr.msk.f32.vlgmr.msra.gmra.mxu1 %vm768_vm3, %v2129_v32  ;;  %5040 = vmatmul.mubr.msk.f32.vlgmr.msra.gmra.mxu0 %vm768_vm3, %v2695_v45  ;;  %v3890_v32 = vld [vmem:[%s6403_s11 + $0x8] sm:$0xff]  ;;  %v3889_v45 = vld [vmem:[%s6403_s11] sm:$0xff] }
 0x25b   : > { %2844 = vmatprep.subr.mxu1 %v2808_v49  ;;  %2941 = vmatprep.subr.mxu0 %v2905_v34  ;;  %v2794_v33 = vpop.permute.xlu1 %2793 }
 0x25c   : > { %2845 = vmatpush1.msra.mxu1 %v2807_v40  ;;  %2942 = vmatpush1.msra.mxu0 %v2904_v51  ;;  %v2805_v48 = vsel %vm1119_vm7, %v2794_v33, %v5753_v50  ;;  %v5876_v50 = vld [vmem:[#allocation2 + $0x30] sm:$0xff] }
 0x25d   : > { %2846 = vmatprep.subr.mxu1 %v2806_v36  ;;  %2943 = vmatprep.subr.mxu0 %v2903_v53  ;;  %v3013_v33 = vld [vmem:[%s6402_s10 + $0x30] sm:$0xff] }
 0x25e   : > { %2944 = vmatpush1.msra.mxu0 %v2902_v54  ;;  %2977 = vmatprep.mubr.f32.mxu0 %v5206_v3  ;;  %v3014_v54 = vld [vmem:[%s6402_s10 + $0x38] sm:$0xff] }
 0x25f   : > { %2847 = vmatpush1.msra.mxu1 %v2805_v48  ;;  %2880 = vmatprep.mubr.f32.mxu1 %v5206_v3 }
 0x260   : > { %5042 = vmatmul.mubr.msk.f32.vlgmr.msra.gmra.mxu0 %vm768_vm3, %v2889_v55  ;;  %5041 = vmatmul.mubr.msk.f32.vlgmr.msra.gmra.mxu1 %vm768_vm3, %v2792_v38 }
 0x261   : > { %3098 = vmatprep.mubr.f32.mxu1 %v5206_v3  ;;  %3191 = vmatprep.mubr.f32.mxu0 %v5206_v3 }
 0x262   : > { %3111 = vrot.lane.b32.xlu1 %v5876_v50, %s6448_s27  ;;  %3018 = vrot.lane.b32.xlu0 %v5876_v50, %s6451_s0 }
 0x268   : > { %v2998_v41 = vpop.permute.xlu1 %2997 }
 0x2d4   : > { %v3112_v46 = vpop.permute.xlu1 %3111  ;;  %v3019_v31 = vpop.permute.xlu0 %3018 }
 0x309   : > { %v2226_v52 = vpop.f32.mrf.mxu0 }
 0x30b   : > { %v2228_v56 = vpop.f32.mrf.mxu0 }
 0x30e   : > { %v2320_v57 = vpop.f32.mrf.mxu1  ;;  %v2395_v58 = vpop.f32.mrf.mxu0 }
 0x30f   : > { %v2321_v4 = vadd.f32 %v2320_v57, %v2226_v52  ;;  %v3204_v57 = vld [vmem:[%s6402_s10 + $0x40] sm:$0xff] }
 0x310   : > { %v2322_v59 = vpop.f32.mrf.mxu1  ;;  %v2397_v60 = vpop.f32.mrf.mxu0 }
 0x311   : > { %v2323_v8 = vadd.f32 %v2322_v59, %v2228_v56  ;;  %v3007_v56 = vld [vmem:[%s6402_s10] sm:$0xff] }
 0x314   : > { %v2489_v61 = vpop.f32.mrf.mxu1  ;;  %v2596_v62 = vpop.f32.mrf.mxu0 }
 0x315   : > { %v2490_v13 = vadd.f32 %v2489_v61, %v2395_v58  ;;  %v3008_v61 = vld [vmem:[%s6402_s10 + $0x8] sm:$0xff] }
 0x316   : > { %v2491_v63 = vpop.f32.mrf.mxu1  ;;  %v2598_v0 = vpop.f32.mrf.mxu0 }
 0x317   : > { %v2492_v15 = vadd.f32 %v2491_v63, %v2397_v60 }
 0x31a   : > { %v2690_v2 = vpop.f32.mrf.mxu1  ;;  %v2785_v1 = vpop.f32.mrf.mxu0 }
 0x31b   : > { %v2790_v11 = vadd.f32 %v2785_v1, %v2321_v4  ;;  %v2691_v14 = vadd.f32 %v2690_v2, %v2596_v62  ;;  %v3205_v62 = vld [vmem:[%s6402_s10 + $0x48] sm:$0xff] }
 0x31c   : > { %v2787_v9 = vpop.f32.mrf.mxu0  ;;  %v2692_v12 = vpop.f32.mrf.mxu1 }
 0x31d   : > { %v2791_v7 = vadd.f32 %v2787_v9, %v2323_v8  ;;  %v2986_v17 = vmul.f32 %v2790_v11, %v5623_v10  ;;  %v2693_v20 = vadd.f32 %v2692_v12, %v2598_v0  ;;  %v3009_v8 = vld [vmem:[%s6402_s10 + $0x10] sm:$0xff] }
 0x31e   : > { %v3385_v9 = vld [vmem:[%s6402_s10 + $0x50] sm:$0xff] }
 0x31f   : > { %v2987_v22 = vmul.f32 %v2791_v7, %v5631_v19 }
 0x320   : > { %v2979_v16 = vpop.f32.mrf.mxu0  ;;  %v2882_v6 = vpop.f32.mrf.mxu1 }
 0x321   : > { %v2984_v39 = vadd.f32 %v2979_v16, %v2691_v14  ;;  %v2887_v21 = vadd.f32 %v2882_v6, %v2490_v13  ;;  %v3010_v13 = vld [vmem:[%s6402_s10 + $0x18] sm:$0xff] }
 0x322   : > { %v2981_v35 = vpop.f32.mrf.mxu0  ;;  %v2884_v23 = vpop.f32.mrf.mxu1  ;;  %v3386_v14 = vld [vmem:[%s6402_s10 + $0x58] sm:$0xff] }
 0x323   : > { %v2990_v24 = vmul.f32 %v2984_v39, %v5629_v18  ;;  %v2988_v25 = vadd.f32 %v2986_v17, %v2887_v21  ;;  %v2985_v26 = vadd.f32 %v2981_v35, %v2693_v20  ;;  %v2888_v5 = vadd.f32 %v2884_v23, %v2492_v15  ;;  %v3011_v39 = vld [vmem:[%s6402_s10 + $0x20] sm:$0xff] }
 0x324   : > { %v3576_v21 = vld [vmem:[%s6402_s10 + $0x60] sm:$0xff] }
 0x325   : > { %v2992_v27 = vadd.f32 %v2990_v24, %v2988_v25  ;;  %v2991_v30 = vmul.f32 %v2985_v26, %v5634_v29  ;;  %v2989_v37 = vadd.f32 %v2987_v22, %v2888_v5  ;;  %v3012_v25 = vld [vmem:[%s6402_s10 + $0x28] sm:$0xff] }
 0x326   : > { %v3577_v26 = vld [vmem:[%s6402_s10 + $0x68] sm:$0xff] }
 0x327   : > { %v3000_v42 = vadd.f32 %v2998_v41, %v2992_v27  ;;  %v2993_v28 = vadd.f32 %v2991_v30, %v2989_v37 }
 0x329   : > { %3113 = vrot.lane.b32.xlu1 %v3000_v42, %s6448_s27  ;;  %3020 = vrot.lane.b32.xlu0 %v3000_v42, %s6451_s0  ;;  %v3001_v43 = vadd.f32 %v2998_v41, %v2993_v28  ;;  %v3774_v28 = vld [vmem:[%s6402_s10 + $0x80] sm:$0xff] }
 0x32d   : > { %3291 = vrot.lane.b32.xlu0 %v3000_v42, %s6443_s25  ;;  %3022 = vrot.lane.b32.xlu1 %v3001_v43, %s6451_s0 }
 0x331   : > { %3289 = vrot.lane.b32.xlu0 %v5876_v50, %s6443_s25  ;;  %3394 = vrot.lane.b32.xlu1 %v5890_v44, %s6449_s26 }
 0x335   : > { %3115 = vrot.lane.b32.xlu0 %v3001_v43, %s6448_s27  ;;  %3390 = vrot.lane.b32.xlu1 %v3000_v42, %s6449_s26 }
 0x339   : > { %3485 = vrot.lane.b32.xlu0 %v3000_v42, %s6445_s28  ;;  %3582 = vrot.lane.b32.xlu1 %v5890_v44, %s6442_s21 }
 0x33d   : > { %3392 = vrot.lane.b32.xlu0 %v3001_v43, %s6449_s26  ;;  %3293 = vrot.lane.b32.xlu1 %v3001_v43, %s6443_s25 }
 0x341   : > { %3483 = vrot.lane.b32.xlu0 %v5876_v50, %s6445_s28  ;;  %3578 = vrot.lane.b32.xlu1 %v3000_v42, %s6442_s21 }
 0x345   : > { %3580 = vrot.lane.b32.xlu0 %v3001_v43, %s6442_s21  ;;  %3487 = vrot.lane.b32.xlu1 %v3001_v43, %s6445_s28 }
 0x349   : > { %3679 = vrot.lane.b32.xlu0 %v3001_v43, %s6450_s20  ;;  %3681 = vrot.lane.b32.xlu1 %v5890_v44, %s6450_s20 }
 0x34d   : > { %3778 = vrot.lane.b32.xlu0 %v3001_v43, %s6444_s22  ;;  %3780 = vrot.lane.b32.xlu1 %v5890_v44, %s6444_s22 }
 0x351   : > { %3677 = vrot.lane.b32.xlu0 %v3000_v42, %s6450_s20  ;;  %3776 = vrot.lane.b32.xlu1 %v3000_v42, %s6444_s22 }
 0x355   : > { %3898 = vperm.xlu0 %5137, %v3890_v32   ;;  %3893 = vperm.xlu1 %5138, %v3889_v45   ;;  %v3676_v45 = vld [vmem:[%s6402_s10 + $0x78] sm:$0xff] }
 0x359   : > { %3941 = vrot.lane.b32.xlu1 %v5876_v50, %s6451_s0 }
 0x35d   : > { %4044 = vrot.lane.b32.xlu1 %v5876_v50, %s6448_s27 }
 0x39b   : > { %v3114_v49 = vpop.permute.xlu1 %3113  ;;  %v3021_v34 = vpop.permute.xlu0 %3020 }
 0x39c   : > { %v3024_v36 = vsel %vm522_vm0, %v3019_v31, %v3021_v34  ;;  %v3117_v58 = vsel %vm608_vm1, %v3112_v46, %v3114_v49  ;;  %v3775_v46 = vld [vmem:[%s6402_s10 + $0x88] sm:$0xff] }
 0x39d   : > { %v3924_v31 = vld [vmem:[#allocation2 + $0x8] sm:$0xff] }
 0x39e   : > { %3947 = vrot.lane.b32.xlu0 %v3924_v31, %s6451_s0 }
 0x39f   : > { %v3023_v40 = vpop.permute.xlu1 %3022  ;;  %v3292_v51 = vpop.permute.xlu0 %3291 }
 0x3a0   : > { %v3025_v47 = vsel %vm522_vm0, %v3021_v34, %v3023_v40 }
 0x3a1   : > { %3064 = vmatprep.subr.mxu1 %v3025_v47 }
 0x3a2   : > { %3065 = vmatpush1.msra.mxu1 %v3024_v36  ;;  %4050 = vrot.lane.b32.xlu0 %v3924_v31, %s6448_s27 }
 0x3a3   : > { %v3395_v48 = vpop.permute.xlu1 %3394  ;;  %5043 = vmatmul.mubr.msk.f32.vlgmr.msra.gmra.mxu1 %vm527_vm2, %v3013_v33  ;;  %3242 = vmatprep.subr.mxu1 %v3001_v43  ;;  %v3290_v53 = vpop.permute.xlu0 %3289 }
 0x3a4   : > { %3243 = vmatpush1.msra.mxu1 %v3000_v42  ;;  %3104 = vmatprep.mubr.f32.mxu1 %v5206_v3  ;;  %v3295_v11 = vsel %vm768_vm3, %v3290_v53, %v3292_v51  ;;  %v3675_v42 = vld [vmem:[%s6402_s10 + $0x70] sm:$0xff] }
 0x3a6   : > { %4238 = vrot.lane.b32.xlu0 %v3924_v31, %s6443_s25 }
 0x3a7   : > { %v3391_v55 = vpop.permute.xlu1 %3390  ;;  %5044 = vmatmul.mubr.msk.f32.gmra.mxu1 %vm527_vm2, %v3014_v54  ;;  %v3116_v38 = vpop.permute.xlu0 %3115 }
 0x3a8   : > { %v3118_v52 = vsel %vm608_vm1, %v3114_v49, %v3116_v38  ;;  %3276 = vmatprep.mubr.f32.mxu1 %v5206_v3  ;;  %v6034_v49 = vld [vmem:[#allocation2 + $0x38] sm:$0xff] }
 0x3a9   : > { %3157 = vmatprep.subr.mxu0 %v3118_v52  ;;  %4359 = vrot.lane.b32.xlu1 %v6034_v49, %s6449_s26 }
 0x3aa   : > { %3158 = vmatpush1.msra.mxu0 %v3117_v58  ;;  %4232 = vrot.lane.b32.xlu0 %v5876_v50, %s6443_s25 }
 0x3ab   : > { %v3583_v59 = vpop.permute.xlu1 %3582  ;;  %5045 = vmatmul.mubr.msk.f32.vlgmr.msra.gmra.mxu0 %vm527_vm2, %v3007_v56  ;;  %5047 = vmatmul.mubr.msk.f32.vlgmr.msra.gmra.mxu1 %vm527_vm2, %v3204_v57  ;;  %v3486_v60 = vpop.permute.xlu0 %3485 }
 0x3ac   : > { %3197 = vmatprep.mubr.f32.mxu0 %v5206_v3  ;;  %3282 = vmatprep.mubr.f32.mxu1 %v5206_v3 }
 0x3ad   : > { %4353 = vrot.lane.b32.xlu1 %v5890_v44, %s6449_s26 }
 0x3ae   : > { %4458 = vrot.lane.b32.xlu0 %v3924_v31, %s6445_s28 }
 0x3af   : > { %v3294_v63 = vpop.permute.xlu1 %3293  ;;  %5046 = vmatmul.mubr.msk.f32.gmra.mxu0 %vm527_vm2, %v3008_v61  ;;  %5048 = vmatmul.mubr.msk.f32.gmra.mxu1 %vm527_vm2, %v3205_v62  ;;  %v3393_v0 = vpop.permute.xlu0 %3392 }
 0x3b0   : > { %v3396_v2 = vsel %vm860_vm4, %v3391_v55, %v3393_v0  ;;  %v3296_v1 = vsel %vm768_vm3, %v3292_v51, %v3294_v63  ;;  %v3397_v4 = vsel %vm860_vm4, %v3393_v0, %v3395_v48  ;;  %3369 = vmatprep.mubr.f32.mxu0 %v5206_v3  ;;  %3470 = vmatprep.mubr.f32.mxu1 %v5206_v3 }
 0x3b1   : > { %3335 = vmatprep.subr.mxu0 %v3296_v1  ;;  %3436 = vmatprep.subr.mxu1 %v3397_v4 }
 0x3b2   : > { %3336 = vmatpush1.msra.mxu0 %v3295_v11  ;;  %3437 = vmatpush1.msra.mxu1 %v3396_v2 }
 0x3b3   : > { %v3579_v12 = vpop.permute.xlu1 %3578  ;;  %5049 = vmatmul.mubr.msk.f32.vlgmr.msra.gmra.mxu0 %vm527_vm2, %v3009_v8  ;;  %5051 = vmatmul.mubr.msk.f32.vlgmr.msra.gmra.mxu1 %vm527_vm2, %v3385_v9  ;;  %v3484_v7 = vpop.permute.xlu0 %3483 }
 0x3b4   : > { %3375 = vmatprep.mubr.f32.mxu0 %v5206_v3  ;;  %3476 = vmatprep.mubr.f32.mxu1 %v5206_v3  ;;  %v3489_v22 = vsel %vm945_vm5, %v3484_v7, %v3486_v60 }
 0x3b5   : > { %4567 = vrot.lane.b32.xlu1 %v6034_v49, %s6442_s21  ;;  %4452 = vrot.lane.b32.xlu0 %v5876_v50, %s6445_s28 }
 0x3b7   : > { %v3488_v15 = vpop.permute.xlu1 %3487  ;;  %5050 = vmatmul.mubr.msk.f32.gmra.mxu0 %vm527_vm2, %v3010_v13  ;;  %5052 = vmatmul.mubr.msk.f32.gmra.mxu1 %vm527_vm2, %v3386_v14  ;;  %v3581_v16 = vpop.permute.xlu0 %3580 }
 0x3b8   : > { %v3584_v6 = vsel %vm1031_vm6, %v3579_v12, %v3581_v16  ;;  %v3490_v17 = vsel %vm945_vm5, %v3486_v60, %v3488_v15  ;;  %v3585_v20 = vsel %vm1031_vm6, %v3581_v16, %v3583_v59  ;;  %3563 = vmatprep.mubr.f32.mxu0 %v5206_v3  ;;  %3658 = vmatprep.mubr.f32.mxu1 %v5206_v3 }
 0x3b9   : > { %3529 = vmatprep.subr.mxu0 %v3490_v17  ;;  %3624 = vmatprep.subr.mxu1 %v3585_v20 }
 0x3ba   : > { %3530 = vmatpush1.msra.mxu0 %v3489_v22  ;;  %3625 = vmatpush1.msra.mxu1 %v3584_v6 }
 0x3bb   : > { %v3682_v35 = vpop.permute.xlu1 %3681  ;;  %5053 = vmatmul.mubr.msk.f32.vlgmr.msra.gmra.mxu0 %vm527_vm2, %v3011_v39  ;;  %5055 = vmatmul.mubr.msk.f32.vlgmr.msra.gmra.mxu1 %vm527_vm2, %v3576_v21  ;;  %v3680_v23 = vpop.permute.xlu0 %3679 }
 0x3bc   : > { %v3684_v24 = vsel %vm1119_vm7, %v3680_v23, %v3682_v35  ;;  %3569 = vmatprep.mubr.f32.mxu0 %v5206_v3  ;;  %3664 = vmatprep.mubr.f32.mxu1 %v5206_v3 }
 0x3bd   : > { %3723 = vmatprep.subr.mxu0 %v3684_v24  ;;  %4561 = vrot.lane.b32.xlu1 %v5890_v44, %s6442_s21 }
 0x3bf   : > { %v3781_v5 = vpop.permute.xlu1 %3780  ;;  %5054 = vmatmul.mubr.msk.f32.gmra.mxu0 %vm527_vm2, %v3012_v25  ;;  %5056 = vmatmul.mubr.msk.f32.gmra.mxu1 %vm527_vm2, %v3577_v26  ;;  %v3779_v27 = vpop.permute.xlu0 %3778 }
 0x3c0   : > { %v3783_v30 = vsel %vm1207_vm8, %v3779_v27, %v3781_v5  ;;  %3757 = vmatprep.mubr.f32.mxu0 %v5206_v3  ;;  %3856 = vmatprep.mubr.f32.mxu1 %v5206_v3 }
 0x3c1   : > { %3822 = vmatprep.subr.mxu1 %v3783_v30 }
 0x3c3   : > { %v3777_v37 = vpop.permute.xlu1 %3776  ;;  %v3678_v41 = vpop.permute.xlu0 %3677 }
 0x3c4   : > { %v3782_v43 = vsel %vm1207_vm8, %v3777_v37, %v3779_v27  ;;  %v3683_v32 = vsel %vm1119_vm7, %v3678_v41, %v3680_v23 }
 0x3c5   : > { %3724 = vmatpush1.msra.mxu0 %v3683_v32  ;;  %3823 = vmatpush1.msra.mxu1 %v3782_v43 }
 0x3c6   : > { %5057 = vmatmul.mubr.msk.f32.vlgmr.msra.gmra.mxu0 %vm527_vm2, %v3675_v42  ;;  %5059 = vmatmul.mubr.msk.f32.vlgmr.msra.gmra.mxu1 %vm527_vm2, %v3774_v28 }
 0x3c7   : > { %3763 = vmatprep.mubr.f32.mxu0 %v5206_v3  ;;  %3862 = vmatprep.mubr.f32.mxu1 %v5206_v3 }
 0x3ca   : > { %5058 = vmatmul.mubr.msk.f32.gmra.mxu0 %vm527_vm2, %v3676_v45  ;;  %5060 = vmatmul.mubr.msk.f32.gmra.mxu1 %vm527_vm2, %v3775_v46 }
 0x3cb   : > { %4031 = vmatprep.mubr.f32.mxu0 %v5206_v3  ;;  %4134 = vmatprep.mubr.f32.mxu1 %v5206_v3 }
 0x463   : > { %v3100_v34 = vpop.f32.mrf.mxu1 }
 0x465   : > { %v3102_v40 = vpop.f32.mrf.mxu1 }
 0x467   : > { %v3106_v51 = vpop.f32.mrf.mxu1 }
 0x469   : > { %v3108_v47 = vpop.f32.mrf.mxu1 }
 0x46b   : > { %v3193_v33 = vpop.f32.mrf.mxu0  ;;  %v3278_v36 = vpop.f32.mrf.mxu1 }
 0x46c   : > { %v3194_v9 = vadd.f32 %v3193_v33, %v3100_v34 }
 0x46d   : > { %v3195_v48 = vpop.f32.mrf.mxu0  ;;  %v3280_v53 = vpop.f32.mrf.mxu1 }
 0x46e   : > { %v3196_v11 = vadd.f32 %v3195_v48, %v3102_v40  ;;  %v3894_v40 = vpop.permute.xlu1 %3893 }
 0x46f   : > { %v3199_v54 = vpop.f32.mrf.mxu0  ;;  %v3284_v55 = vpop.f32.mrf.mxu1 }
 0x470   : > { %v3200_v7 = vadd.f32 %v3199_v54, %v3106_v51 }
 0x471   : > { %v3201_v38 = vpop.f32.mrf.mxu0  ;;  %v3286_v52 = vpop.f32.mrf.mxu1 }
 0x472   : > { %v3202_v17 = vadd.f32 %v3201_v38, %v3108_v47 }
 0x473   : > { %v3371_v56 = vpop.f32.mrf.mxu0  ;;  %v3472_v57 = vpop.f32.mrf.mxu1 }
 0x474   : > { %v3372_v16 = vadd.f32 %v3371_v56, %v3278_v36 }
 0x475   : > { %v3373_v58 = vpop.f32.mrf.mxu0  ;;  %v3474_v59 = vpop.f32.mrf.mxu1 }
 0x476   : > { %v3374_v20 = vadd.f32 %v3373_v58, %v3280_v53 }
 0x477   : > { %v3377_v50 = vpop.f32.mrf.mxu0  ;;  %v3478_v60 = vpop.f32.mrf.mxu1 }
 0x478   : > { %v3378_v26 = vadd.f32 %v3377_v50, %v3284_v55 }
 0x479   : > { %v3379_v61 = vpop.f32.mrf.mxu0  ;;  %v3480_v62 = vpop.f32.mrf.mxu1 }
 0x47a   : > { %v3380_v32 = vadd.f32 %v3379_v61, %v3286_v52 }
 0x47b   : > { %v3565_v63 = vpop.f32.mrf.mxu0  ;;  %v3660_v0 = vpop.f32.mrf.mxu1 }
 0x47c   : > { %v3671_v12 = vadd.f32 %v3660_v0, %v3194_v9  ;;  %v3566_v6 = vadd.f32 %v3565_v63, %v3472_v57 }
 0x47d   : > { %v3567_v2 = vpop.f32.mrf.mxu0  ;;  %v3662_v1 = vpop.f32.mrf.mxu1 }
 0x47e   : > { %v3672_v13 = vadd.f32 %v3662_v1, %v3196_v11  ;;  %v3873_v35 = vmul.f32 %v3671_v12, %v5623_v10  ;;  %v3568_v23 = vadd.f32 %v3567_v2, %v3474_v59 }
 0x47f   : > { %v3571_v4 = vpop.f32.mrf.mxu0  ;;  %v3666_v8 = vpop.f32.mrf.mxu1 }
 0x480   : > { %v3673_v39 = vadd.f32 %v3666_v8, %v3200_v7  ;;  %v3874_v5 = vmul.f32 %v3672_v13, %v5631_v19  ;;  %v3572_v45 = vadd.f32 %v3571_v4, %v3478_v60 }
 0x481   : > { %v3573_v14 = vpop.f32.mrf.mxu0  ;;  %v3668_v15 = vpop.f32.mrf.mxu1 }
 0x482   : > { %v3674_v27 = vadd.f32 %v3668_v15, %v3202_v17  ;;  %v3875_v46 = vmul.f32 %v3673_v39, %v5623_v10  ;;  %v3574_v48 = vadd.f32 %v3573_v14, %v3480_v62  ;;  %v3899_v62 = vpop.permute.xlu0 %3898 }
 0x484   : > { %v3876_v53 = vmul.f32 %v3674_v27, %v5631_v19 }
 0x486   : > { %v3759_v21 = vpop.f32.mrf.mxu0  ;;  %v3858_v22 = vpop.f32.mrf.mxu1 }
 0x487   : > { %v3770_v24 = vadd.f32 %v3759_v21, %v3372_v16  ;;  %v3869_v25 = vadd.f32 %v3858_v22, %v3566_v6  ;;  %v4898_v16 = vld [vmem:[%s6405_s13] sm:$0xff]  ;;  %v3948_v6 = vpop.permute.xlu0 %3947 }
 0x488   : > { %v3761_v30 = vpop.f32.mrf.mxu0  ;;  %v3860_v37 = vpop.f32.mrf.mxu1 }
 0x489   : > { %v3877_v41 = vadd.f32 %v3873_v35, %v3770_v24  ;;  %v3881_v42 = vmul.f32 %v3869_v25, %v5629_v18  ;;  %v3771_v28 = vadd.f32 %v3761_v30, %v3374_v20  ;;  %v3870_v43 = vadd.f32 %v3860_v37, %v3568_v23 }
 0x48a   : > { %v3765_v31 = vpop.f32.mrf.mxu0  ;;  %v3864_v34 = vpop.f32.mrf.mxu1 }
 0x48b   : > { %v3885_v51 = vadd.f32 %v3881_v42, %v3877_v41  ;;  %v3878_v47 = vadd.f32 %v3874_v5, %v3771_v28  ;;  %v3882_v33 = vmul.f32 %v3870_v43, %v5634_v29  ;;  %v3772_v36 = vadd.f32 %v3765_v31, %v3378_v26  ;;  %v4051_v20 = vpop.permute.xlu0 %4050 }
 0x48c   : > { %v3871_v54 = vadd.f32 %v3864_v34, %v3572_v45  ;;  %v3767_v55 = vpop.f32.mrf.mxu0  ;;  %v3866_v38 = vpop.f32.mrf.mxu1 }
 0x48d   : > { %v3901_v56 = vadd.f32 %v3894_v40, %v3885_v51  ;;  %v3886_v57 = vadd.f32 %v3882_v33, %v3878_v47  ;;  %v3879_v52 = vadd.f32 %v3875_v46, %v3772_v36  ;;  %v3773_v58 = vadd.f32 %v3767_v55, %v3380_v32  ;;  %v3933_v55 = vld [vmem:[%s6404_s12 + $0x30] sm:$0xff] }
 0x48e   : > { %v3883_v59 = vmul.f32 %v3871_v54, %v5629_v18  ;;  %v3872_v50 = vadd.f32 %v3866_v38, %v3574_v48 }
 0x48f   : > { %vm3905_vm9 = vcmp.ge.f32.partialorder %v3901_v56, 0.0  ;;  %v3909_v60 = vmul.f32 0.1, %v3901_v56  ;;  %v3902_v61 = vadd.f32 %v3894_v40, %v3886_v57  ;;  %v3880_v63 = vadd.f32 %v3876_v53, %v3773_v58  ;;  %v6146_v21 = vpop.permute.xlu0 %4238 }
 0x490   : > { %v3887_v0 = vadd.f32 %v3883_v59, %v3879_v52  ;;  %v3884_v2 = vmul.f32 %v3872_v50, %v5634_v29  ;;  %v3934_v52 = vld [vmem:[%s6404_s12 + $0x38] sm:$0xff] }
 0x491   : > { %v6058_v1 = vsel %vm3905_vm9, %v3901_v56, %v3909_v60  ;;  %vm3906_vm10 = vcmp.ge.f32.partialorder %v3902_v61, 0.0  ;;  %v3910_v4 = vmul.f32 0.1, %v3902_v61 }
 0x492   : > { %v3903_v8 = vadd.f32 %v3899_v62, %v3887_v0  ;;  %v3888_v9 = vadd.f32 %v3884_v2, %v3880_v63  ;;  %4234 = vrot.lane.b32.xlu0 %v6058_v1, %s6443_s25  ;;  %3943 = vrot.lane.b32.xlu1 %v6058_v1, %s6451_s0  ;;  %v3927_v63 = vld [vmem:[%s6404_s12] sm:$0xff] }
 0x493   : > { %v6064_v11 = vsel %vm3906_vm10, %v3902_v61, %v3910_v4  ;;  %v6150_v35 = vpop.permute.xlu0 %4232  ;;  %v4147_v0 = vld [vmem:[%s6404_s12 + $0x40] sm:$0xff]  ;;  %v3928_v4 = vld [vmem:[%s6404_s12 + $0x8] sm:$0xff] }
 0x494   : > { %vm3907_vm11 = vcmp.ge.f32.partialorder %v3903_v8, 0.0  ;;  %v3911_v12 = vmul.f32 0.1, %v3903_v8  ;;  %v3904_v7 = vadd.f32 %v3899_v62, %v3888_v9 }
 0x496   : > { %v6066_v13 = vsel %vm3907_vm11, %v3903_v8, %v3911_v12  ;;  %vm3908_vm12 = vcmp.ge.f32.partialorder %v3904_v7, 0.0  ;;  %v3912_v14 = vmul.f32 0.1, %v3904_v7  ;;  %4454 = vrot.lane.b32.xlu0 %v6058_v1, %s6445_s28  ;;  %4046 = vrot.lane.b32.xlu1 %v6058_v1, %s6448_s27  ;;  %v4148_v8 = vld [vmem:[%s6404_s12 + $0x48] sm:$0xff] }
 0x497   : > { %v6154_v24 = vpop.permute.xlu0 %4458 }
 0x498   : > { %v6072_v15 = vsel %vm3908_vm12, %v3904_v7, %v3912_v14 }
 0x49a   : > { %4349 = vrot.lane.b32.xlu1 %v6058_v1, %s6449_s26  ;;  %3945 = vrot.lane.b32.xlu0 %v6064_v11, %s6451_s0 }
 0x49b   : > { %v6158_v26 = vpop.permute.xlu0 %4452 }
 0x49e   : > { %4557 = vrot.lane.b32.xlu1 %v6058_v1, %s6442_s21  ;;  %4048 = vrot.lane.b32.xlu0 %v6064_v11, %s6448_s27 }
 0x4a2   : > { %4236 = vrot.lane.b32.xlu1 %v6064_v11, %s6443_s25  ;;  %4351 = vrot.lane.b32.xlu0 %v6064_v11, %s6449_s26 }
 0x4a6   : > { %4456 = vrot.lane.b32.xlu1 %v6064_v11, %s6445_s28  ;;  %4559 = vrot.lane.b32.xlu0 %v6064_v11, %s6442_s21 }
 0x4aa   : > { %4355 = vrot.lane.b32.xlu1 %v6066_v13, %s6449_s26  ;;  %3949 = vrot.lane.b32.xlu0 %v6066_v13, %s6451_s0 }
 0x4ae   : > { %4563 = vrot.lane.b32.xlu1 %v6066_v13, %s6442_s21  ;;  %4052 = vrot.lane.b32.xlu0 %v6066_v13, %s6448_s27 }
 0x4b2   : > { %3951 = vrot.lane.b32.xlu1 %v6072_v15, %s6451_s0  ;;  %4240 = vrot.lane.b32.xlu0 %v6066_v13, %s6443_s25 }
 0x4b6   : > { %4676 = vrot.lane.b32.xlu1 %v6034_v49, %s6450_s20  ;;  %4460 = vrot.lane.b32.xlu0 %v6066_v13, %s6445_s28 }
 0x4ba   : > { %4054 = vrot.lane.b32.xlu1 %v6072_v15, %s6448_s27  ;;  %4672 = vrot.lane.b32.xlu0 %v6066_v13, %s6450_s20  ;;  %s6452_s27 = sand.u32 1, %s5193_s30  }
 0x4be   : > { %4785 = vrot.lane.b32.xlu1 %v6034_v49, %s6444_s22  ;;  %4668 = vrot.lane.b32.xlu0 %v6064_v11, %s6450_s20  ;;  %v4899_v49 = vld [vmem:[%s6405_s13 + $0x8] sm:$0xff] }
 0x4c2   : > { %4242 = vrot.lane.b32.xlu1 %v6072_v15, %s6443_s25  ;;  %4357 = vrot.lane.b32.xlu0 %v6072_v15, %s6449_s26  ;;  %s5141_s26 = scalar_lea.vmem %s4936_s4, 256 }
 0x4c3   : > { %p5142_p12 = scmp.ne.s32.totalorder %s4936_s4, %s5141_s26 }
 0x4c5   : > { %p5143_p13 = pnand %p5142_p12, %p5328_p5 }
 0x4c6   : > { %4781 = vrot.lane.b32.xlu1 %v6066_v13, %s6444_s22  ;;  %4777 = vrot.lane.b32.xlu0 %v6064_v11, %s6444_s22 }
 0x4c7   : > { %p5144_p0 = pneg %p5143_p13 }
 0x4ca   : > { %4462 = vrot.lane.b32.xlu1 %v6072_v15, %s6445_s28  ;;  %4565 = vrot.lane.b32.xlu0 %v6072_v15, %s6442_s21  ;;  %s4933_s28 = scalar_lea.hbm %s6406_s14, %s5086_s3 }
 0x4ce   : > { %4670 = vrot.lane.b32.xlu1 %v5890_v44, %s6450_s20  ;;  %4674 = vrot.lane.b32.xlu0 %v6072_v15, %s6450_s20 }
 0x4d2   : > { %4779 = vrot.lane.b32.xlu1 %v5890_v44, %s6444_s22  ;;  %4783 = vrot.lane.b32.xlu0 %v6072_v15, %s6444_s22  ;;  %v3942_v44 = vpop.permute.xlu1 %3941 }
 0x4d6   : > { %4775 = vrot.lane.b32.xlu1 %v6058_v1, %s6444_s22  ;;  %4666 = vrot.lane.b32.xlu0 %v6058_v1, %s6450_s20  ;;  %v4045_v17 = vpop.permute.xlu1 %4044  ;;  %s4921_s22 = scalar_lea.sflag [#allocation4], %s6452_s27  ;;  %s5145_s20 = sshll.u32 %s5214_s17, 4  ;;  %s5146_s20 = int_to_ptr.vmem [resolvable:$false] %s5145_s20 }
 0x4d7   : > { %p5148_p1 = scmp.lt.s32.totalorder %s4936_s4, %s5146_s20 }
 0x4da   : > { %4907 = vperm.xlu1 %5138, %v4899_v49   ;;  %4902 = vperm.xlu0 %5137, %v4898_v16   ;;  %v6144_v39 = vpop.permute.xlu1 %4359 }
 0x4de   : > { %v6148_v22 = vpop.permute.xlu1 %4353 }
 0x4e2   : > { %v6152_v23 = vpop.permute.xlu1 %4567 }
 0x4e6   : > { %v6156_v25 = vpop.permute.xlu1 %4561 }
 0x504   : > { %v3944_v5 = vpop.permute.xlu1 %3943  ;;  %v6160_v27 = vpop.permute.xlu0 %4234 }
 0x505   : > { %v3953_v38 = vsel %vm522_vm0, %v3942_v44, %v3944_v5 }
 0x508   : > { %v4047_v30 = vpop.permute.xlu1 %4046  ;;  %v6162_v37 = vpop.permute.xlu0 %4454 }
 0x509   : > { %v4056_v2 = vsel %vm608_vm1, %v4045_v17, %v4047_v30  ;;  %v3929_v17 = vld [vmem:[%s6404_s12 + $0x10] sm:$0xff] }
 0x50c   : > { %v6164_v41 = vpop.permute.xlu1 %4349  ;;  %v3946_v42 = vpop.permute.xlu0 %3945 }
 0x50d   : > { %v3954_v54 = vsel %vm522_vm0, %v3944_v5, %v3946_v42  ;;  %v3930_v5 = vld [vmem:[%s6404_s12 + $0x18] sm:$0xff] }
 0x510   : > { %v6166_v28 = vpop.permute.xlu1 %4557  ;;  %v4049_v43 = vpop.permute.xlu0 %4048 }
 0x511   : > { %v4057_v61 = vsel %vm608_vm1, %v4047_v30, %v4049_v43 }
 0x514   : > { %v6168_v32 = vpop.permute.xlu1 %4236  ;;  %v6170_v45 = vpop.permute.xlu0 %4351 }
 0x515   : > { %v4245_v49 = vsel %vm768_vm3, %v6160_v27, %v6168_v32  ;;  %v4362_v16 = vsel %vm860_vm4, %v6170_v45, %v6148_v22 }
 0x518   : > { %v6172_v46 = vpop.permute.xlu1 %4456  ;;  %v6174_v31 = vpop.permute.xlu0 %4559 }
 0x519   : > { %v4465_v32 = vsel %vm945_vm5, %v6162_v37, %v6172_v46  ;;  %v4569_v46 = vsel %vm1031_vm6, %v6166_v28, %v6174_v31  ;;  %v3932_v28 = vld [vmem:[%s6404_s12 + $0x28] sm:$0xff] }
 0x51c   : > { %v4356_v34 = vpop.permute.xlu1 %4355  ;;  %v3950_v40 = vpop.permute.xlu0 %3949 }
 0x51d   : > { %v3955_v53 = vsel %vm522_vm0, %v3948_v6, %v3950_v40  ;;  %v4244_v6 = vsel %vm768_vm3, %v6150_v35, %v6160_v27  ;;  %v4342_v27 = vld [vmem:[%s6404_s12 + $0x58] sm:$0xff] }
 0x520   : > { %v6176_v51 = vpop.permute.xlu1 %4563  ;;  %v4053_v47 = vpop.permute.xlu0 %4052 }
 0x521   : > { %v4058_v60 = vsel %vm608_vm1, %v4051_v20, %v4053_v47  ;;  %v4341_v20 = vld [vmem:[%s6404_s12 + $0x50] sm:$0xff] }
 0x524   : > { %v3952_v33 = vpop.permute.xlu1 %3951  ;;  %v4241_v36 = vpop.permute.xlu0 %4240 }
 0x525   : > { %v3956_v48 = vsel %vm522_vm0, %v3950_v40, %v3952_v33  ;;  %v4246_v14 = vsel %vm768_vm3, %v6146_v21, %v4241_v36  ;;  %v4555_v40 = vld [vmem:[%s6404_s12 + $0x60] sm:$0xff] }
 0x526   : > { %3995 = vmatprep.subr.mxu0 %v3956_v48 }
 0x527   : > { %3996 = vmatpush1.msra.mxu0 %v3955_v53 }
 0x528   : > { %v6185_v56 = vpop.permute.xlu1 %4676  ;;  %3997 = vmatprep.subr.mxu0 %v3954_v54  ;;  %v6187_v57 = vpop.permute.xlu0 %4460 }
 0x529   : > { %3998 = vmatpush1.msra.mxu0 %v3953_v38  ;;  %v4466_v42 = vsel %vm945_vm5, %v6154_v24, %v6187_v57  ;;  %v4464_v24 = vsel %vm945_vm5, %v6158_v26, %v6162_v37 }
 0x52a   : > { %5061 = vmatmul.mubr.msk.f32.vlgmr.msra.gmra.mxu0 %vm768_vm3, %v3933_v55  ;;  %4183 = vmatprep.subr.mxu0 %v6072_v15 }
 0x52b   : > { %4184 = vmatpush1.msra.mxu0 %v6066_v13  ;;  %4037 = vmatprep.mubr.f32.mxu0 %v5206_v3 }
 0x52c   : > { %v4055_v58 = vpop.permute.xlu1 %4054  ;;  %4185 = vmatprep.subr.mxu0 %v6064_v11  ;;  %v6197_v59 = vpop.permute.xlu0 %4672 }
 0x52d   : > { %4186 = vmatpush1.msra.mxu0 %v6058_v1  ;;  %v4059_v50 = vsel %vm608_vm1, %v4053_v47, %v4055_v58  ;;  %v4774_v58 = vld [vmem:[%s6404_s12 + $0x88] sm:$0xff] }
 0x52e   : > { %5062 = vmatmul.mubr.msk.f32.gmra.mxu0 %vm768_vm3, %v3934_v52  ;;  %4098 = vmatprep.subr.mxu1 %v4059_v50  ;;  %v4665_v52 = vld [vmem:[%s6404_s12 + $0x78] sm:$0xff] }
 0x52f   : > { %4099 = vmatpush1.msra.mxu1 %v4058_v60  ;;  %4219 = vmatprep.mubr.f32.mxu0 %v5206_v3 }
 0x530   : > { %v6212_v62 = vpop.permute.xlu1 %4785  ;;  %4100 = vmatprep.subr.mxu1 %v4057_v61  ;;  %v6214_v1 = vpop.permute.xlu0 %4668 }
 0x531   : > { %4101 = vmatpush1.msra.mxu1 %v4056_v2 }
 0x532   : > { %5063 = vmatmul.mubr.msk.f32.vlgmr.msra.gmra.mxu1 %vm768_vm3, %v3927_v63  ;;  %5065 = vmatmul.mubr.msk.f32.vlgmr.msra.gmra.mxu0 %vm768_vm3, %v4147_v0 }
 0x533   : > { %4140 = vmatprep.mubr.f32.mxu1 %v5206_v3  ;;  %4225 = vmatprep.mubr.f32.mxu0 %v5206_v3 }
 0x534   : > { %v4243_v9 = vpop.permute.xlu1 %4242  ;;  %v4358_v11 = vpop.permute.xlu0 %4357 }
 0x535   : > { %v4363_v12 = vsel %vm860_vm4, %v4356_v34, %v4358_v11  ;;  %v4247_v7 = vsel %vm768_vm3, %v4241_v36, %v4243_v9  ;;  %v4364_v13 = vsel %vm860_vm4, %v4358_v11, %v6144_v39  ;;  %v4361_v39 = vsel %vm860_vm4, %v6164_v41, %v6170_v45  ;;  %v3931_v34 = vld [vmem:[%s6404_s12 + $0x20] sm:$0xff] }
 0x536   : > { %5064 = vmatmul.mubr.msk.f32.gmra.mxu1 %vm768_vm3, %v3928_v4  ;;  %5066 = vmatmul.mubr.msk.f32.gmra.mxu0 %vm768_vm3, %v4148_v8 }
 0x537   : > { %4286 = vmatprep.subr.mxu1 %v4247_v7  ;;  %4403 = vmatprep.subr.mxu0 %v4364_v13 }
 0x538   : > { %4287 = vmatpush1.msra.mxu1 %v4246_v14  ;;  %4404 = vmatpush1.msra.mxu0 %v4363_v12  ;;  %v4782_v15 = vpop.permute.xlu1 %4781  ;;  %v6240_v44 = vpop.permute.xlu0 %4777 }
 0x539   : > { %4288 = vmatprep.subr.mxu1 %v4245_v49  ;;  %4405 = vmatprep.subr.mxu0 %v4362_v16 }
 0x53a   : > { %4289 = vmatpush1.msra.mxu1 %v4244_v6  ;;  %4322 = vmatprep.mubr.f32.mxu1 %v5206_v3 }
 0x53b   : > { %4406 = vmatpush1.msra.mxu0 %v4361_v39  ;;  %4439 = vmatprep.mubr.f32.mxu0 %v5206_v3 }
 0x53c   : > { %5067 = vmatmul.mubr.msk.f32.vlgmr.msra.gmra.mxu1 %vm768_vm3, %v3929_v17  ;;  %5069 = vmatmul.mubr.msk.f32.vlgmr.msra.gmra.mxu0 %vm768_vm3, %v4341_v20  ;;  %v4463_v21 = vpop.permute.xlu1 %4462  ;;  %v4566_v22 = vpop.permute.xlu0 %4565 }
 0x53d   : > { %v4571_v35 = vsel %vm1031_vm6, %v6176_v51, %v4566_v22  ;;  %4328 = vmatprep.mubr.f32.mxu1 %v5206_v3  ;;  %4445 = vmatprep.mubr.f32.mxu0 %v5206_v3  ;;  %v4467_v30 = vsel %vm945_vm5, %v6187_v57, %v4463_v21  ;;  %v4572_v41 = vsel %vm1031_vm6, %v4566_v22, %v6152_v23  ;;  %v4773_v57 = vld [vmem:[%s6404_s12 + $0x80] sm:$0xff] }
 0x53e   : > { %4506 = vmatprep.subr.mxu1 %v4467_v30  ;;  %4611 = vmatprep.subr.mxu0 %v4572_v41  ;;  %v4570_v23 = vsel %vm1031_vm6, %v6174_v31, %v6156_v25  ;;  %v4556_v31 = vld [vmem:[%s6404_s12 + $0x68] sm:$0xff] }
 0x53f   : > { %4507 = vmatpush1.msra.mxu1 %v4466_v42  ;;  %4612 = vmatpush1.msra.mxu0 %v4571_v35 }
 0x540   : > { %5068 = vmatmul.mubr.msk.f32.gmra.mxu1 %vm768_vm3, %v3930_v5  ;;  %5070 = vmatmul.mubr.msk.f32.gmra.mxu0 %vm768_vm3, %v4342_v27  ;;  %v4671_v43 = vpop.permute.xlu1 %4670  ;;  %v4675_v45 = vpop.permute.xlu0 %4674 }
 0x541   : > { %4508 = vmatprep.subr.mxu1 %v4465_v32  ;;  %4613 = vmatprep.subr.mxu0 %v4570_v23  ;;  %v4681_v25 = vsel %vm1119_vm7, %v4675_v45, %v6185_v56  ;;  %v4680_v26 = vsel %vm1119_vm7, %v6197_v59, %v4675_v45  ;;  %v4679_v33 = vsel %vm1119_vm7, %v6214_v1, %v4671_v43  ;;  %v4664_v56 = vld [vmem:[%s6404_s12 + $0x70] sm:$0xff] }
 0x542   : > { %4509 = vmatpush1.msra.mxu1 %v4464_v24  ;;  %4542 = vmatprep.mubr.f32.mxu1 %v5206_v3 }
 0x543   : > { %4614 = vmatpush1.msra.mxu0 %v4569_v46  ;;  %4647 = vmatprep.mubr.f32.mxu0 %v5206_v3 }
 0x544   : > { %5071 = vmatmul.mubr.msk.f32.vlgmr.msra.gmra.mxu1 %vm768_vm3, %v3931_v34  ;;  %5073 = vmatmul.mubr.msk.f32.vlgmr.msra.gmra.mxu0 %vm768_vm3, %v4555_v40  ;;  %v4780_v37 = vpop.permute.xlu1 %4779  ;;  %v4784_v51 = vpop.permute.xlu0 %4783 }
 0x545   : > { %4720 = vmatprep.subr.mxu1 %v4681_v25  ;;  %4548 = vmatprep.mubr.f32.mxu1 %v5206_v3  ;;  %v4790_v47 = vsel %vm1207_vm8, %v4784_v51, %v6212_v62  ;;  %v4789_v36 = vsel %vm1207_vm8, %v4782_v15, %v4784_v51  ;;  %v4788_v55 = vsel %vm1207_vm8, %v6240_v44, %v4780_v37 }
 0x546   : > { %4721 = vmatpush1.msra.mxu1 %v4680_v26  ;;  %4653 = vmatprep.mubr.f32.mxu0 %v5206_v3 }
 0x547   : > { %4722 = vmatprep.subr.mxu1 %v4679_v33  ;;  %4829 = vmatprep.subr.mxu0 %v4790_v47 }
 0x548   : > { %5072 = vmatmul.mubr.msk.f32.gmra.mxu1 %vm768_vm3, %v3932_v28  ;;  %5074 = vmatmul.mubr.msk.f32.gmra.mxu0 %vm768_vm3, %v4556_v31  ;;  %v4776_v48 = vpop.permute.xlu1 %4775  ;;  %v4667_v53 = vpop.permute.xlu0 %4666 }
 0x549   : > { %4830 = vmatpush1.msra.mxu0 %v4789_v36  ;;  %v4787_v54 = vsel %vm1207_vm8, %v4776_v48, %v6240_v44  ;;  %v4678_v38 = vsel %vm1119_vm7, %v4667_v53, %v6214_v1  ;;  %4756 = vmatprep.mubr.f32.mxu1 %v5206_v3 }
 0x54a   : > { %4831 = vmatprep.subr.mxu0 %v4788_v55  ;;  %4723 = vmatpush1.msra.mxu1 %v4678_v38 }
 0x54b   : > { %4832 = vmatpush1.msra.mxu0 %v4787_v54  ;;  %4865 = vmatprep.mubr.f32.mxu0 %v5206_v3 }
 0x54c   : > { %5075 = vmatmul.mubr.msk.f32.vlgmr.msra.gmra.mxu1 %vm768_vm3, %v4664_v56  ;;  %5077 = vmatmul.mubr.msk.f32.vlgmr.msra.gmra.mxu0 %vm768_vm3, %v4773_v57 }
 0x54d   : > { %4762 = vmatprep.mubr.f32.mxu1 %v5206_v3  ;;  %4871 = vmatprep.mubr.f32.mxu0 %v5206_v3 }
 0x550   : > { %5076 = vmatmul.mubr.msk.f32.gmra.mxu1 %vm768_vm3, %v4665_v52  ;;  %5078 = vmatmul.mubr.msk.f32.gmra.mxu0 %vm768_vm3, %v4774_v58 }
 0x5ea   : > { %v4033_v59 = vpop.f32.mrf.mxu0 }
 0x5ec   : > { %v4035_v50 = vpop.f32.mrf.mxu0 }
 0x5ee   : > { %v4039_v60 = vpop.f32.mrf.mxu0 }
 0x5f0   : > { %v4041_v61 = vpop.f32.mrf.mxu0 }
 0x5f2   : > { %v4136_v63 = vpop.f32.mrf.mxu1  ;;  %v4221_v0 = vpop.f32.mrf.mxu0 }
 0x5f3   : > { %v4137_v20 = vadd.f32 %v4136_v63, %v4033_v59 }
 0x5f4   : > { %v4138_v2 = vpop.f32.mrf.mxu1  ;;  %v4223_v3 = vpop.f32.mrf.mxu0 }
 0x5f5   : > { %v4139_v39 = vadd.f32 %v4138_v2, %v4035_v50  ;;  %v4903_v2 = vpop.permute.xlu0 %4902 }
 0x5f6   : > { %v4142_v62 = vpop.f32.mrf.mxu1  ;;  %v4227_v1 = vpop.f32.mrf.mxu0 }
 0x5f7   : > { %v4143_v5 = vadd.f32 %v4142_v62, %v4039_v60 }
 0x5f8   : > { %v4144_v4 = vpop.f32.mrf.mxu1  ;;  %v4229_v8 = vpop.f32.mrf.mxu0 }
 0x5f9   : > { %v4145_v32 = vadd.f32 %v4144_v4, %v4041_v61 }
 0x5fc   : > { %v4324_v9 = vpop.f32.mrf.mxu1  ;;  %v4441_v11 = vpop.f32.mrf.mxu0 }
 0x5fd   : > { %v4325_v42 = vadd.f32 %v4324_v9, %v4221_v0 }
 0x5fe   : > { %v4326_v12 = vpop.f32.mrf.mxu1  ;;  %v4443_v7 = vpop.f32.mrf.mxu0 }
 0x5ff   : > { %v4327_v23 = vadd.f32 %v4326_v12, %v4223_v3 }
 0x600   : > { %v4330_v13 = vpop.f32.mrf.mxu1  ;;  %v4447_v14 = vpop.f32.mrf.mxu0 }
 0x601   : > { %v4331_v37 = vadd.f32 %v4330_v13, %v4227_v1 }
 0x602   : > { %v4332_v15 = vpop.f32.mrf.mxu1  ;;  %v4449_v49 = vpop.f32.mrf.mxu0 }
 0x603   : > { %v4333_v54 = vadd.f32 %v4332_v15, %v4229_v8 }
 0x604   : > { %v4544_v16 = vpop.f32.mrf.mxu1  ;;  %v4649_v44 = vpop.f32.mrf.mxu0 }
 0x605   : > { %v4660_v35 = vadd.f32 %v4649_v44, %v4137_v20  ;;  %v4545_v43 = vadd.f32 %v4544_v16, %v4441_v11 }
 0x606   : > { %v4546_v6 = vpop.f32.mrf.mxu1  ;;  %v4651_v17 = vpop.f32.mrf.mxu0 }
 0x607   : > { %v4661_v27 = vadd.f32 %v4651_v17, %v4139_v39  ;;  %v4882_v40 = vmul.f32 %v4660_v35, %v5623_v10  ;;  %v4547_v46 = vadd.f32 %v4546_v6, %v4443_v7  ;;  %v5140_v6 = vld [vmem:[%s5349_s19 + $0x8] sm:$0xff] }
 0x608   : > { %v4550_v21 = vpop.f32.mrf.mxu1  ;;  %v4655_v22 = vpop.f32.mrf.mxu0 }
 0x609   : > { %v4662_v45 = vadd.f32 %v4655_v22, %v4143_v5  ;;  %v4883_v51 = vmul.f32 %v4661_v27, %v5631_v19  ;;  %v4551_v55 = vadd.f32 %v4550_v21, %v4447_v14  ;;  %v4908_v14 = vpop.permute.xlu1 %4907 }
 0x60a   : > { %v4552_v30 = vpop.f32.mrf.mxu1  ;;  %v4657_v41 = vpop.f32.mrf.mxu0 }
 0x60b   : > { %v4663_v28 = vadd.f32 %v4657_v41, %v4145_v32  ;;  %v4884_v38 = vmul.f32 %v4662_v45, %v5623_v10  ;;  %v4553_v60 = vadd.f32 %v4552_v30, %v4449_v49  ;;  %v5139_v49 = vld [vmem:[%s5349_s19] sm:$0xff]  ;;  %s5147_s19 = scalar_lea.vmem %s5146_s20, 512 }
 0x60c   : > { %v4758_v24 = vpop.f32.mrf.mxu1  ;;  %v4867_v34 = vpop.f32.mrf.mxu0  ;;  %p5149_p2 = scmp.lt.s32.totalorder %s5147_s19, %s5141_s26 }
 0x60d   : > { %v4769_v25 = vadd.f32 %v4758_v24, %v4325_v42  ;;  %v4878_v26 = vadd.f32 %v4867_v34, %v4545_v43  ;;  %v4885_v3 = vmul.f32 %v4663_v28, %v5631_v19 }
 0x60e   : > { %v4760_v31 = vpop.f32.mrf.mxu1  ;;  %v4869_v47 = vpop.f32.mrf.mxu0  ;;  %p5150_p3 = por %p5149_p2, %p5148_p1 }
 0x60f   : > { %v4886_v33 = vadd.f32 %v4882_v40, %v4769_v25  ;;  %v4890_v36 = vmul.f32 %v4878_v26, %v5629_v18  ;;  %v4770_v48 = vadd.f32 %v4760_v31, %v4327_v23  ;;  %v4879_v53 = vadd.f32 %v4869_v47, %v4547_v46 }
 0x610   : > { %v4764_v56 = vpop.f32.mrf.mxu1  ;;  %v4873_v57 = vpop.f32.mrf.mxu0  ;;  %p5151_p4 = pnand %p5150_p3, %p5144_p0 }
 0x611   : > { %v4894_v52 = vadd.f32 %v4890_v36, %v4886_v33  ;;  %v4887_v58 = vadd.f32 %v4883_v51, %v4770_v48  ;;  %v4891_v59 = vmul.f32 %v4879_v53, %v5634_v29  ;;  %v4771_v50 = vadd.f32 %v4764_v56, %v4331_v37 }
 0x612   : > { %v4880_v61 = vadd.f32 %v4873_v57, %v4551_v55  ;;  %v4766_v63 = vpop.f32.mrf.mxu1  ;;  %v4875_v0 = vpop.f32.mrf.mxu0 }
 0x613   : > { %v4895_v62 = vadd.f32 %v4891_v59, %v4887_v58  ;;  %v4888_v1 = vadd.f32 %v4884_v38, %v4771_v50  ;;  %v4772_v10 = vadd.f32 %v4766_v63, %v4333_v54  ;;  %v4910_v4 = vadd.f32 %v4903_v2, %v4894_v52 }
 0x614   : > { %v4892_v8 = vmul.f32 %v4880_v61, %v5629_v18  ;;  %v4881_v9 = vadd.f32 %v4875_v0, %v4553_v60 }
 0x615   : > { %v4889_v11 = vadd.f32 %v4885_v3, %v4772_v10  ;;  %v4911_v12 = vadd.f32 %v4903_v2, %v4895_v62  ;;  %v4914_v16 = vmul.f32 %v5139_v49, %v4910_v4 }
 0x616   : > { %v4896_v7 = vadd.f32 %v4892_v8, %v4888_v1  ;;  %v4893_v13 = vmul.f32 %v4881_v9, %v5634_v29 }
 0x617   : > { %v4915_v18 = vmul.f32 %v5140_v6, %v4911_v12 }
 0x618   : > { %v4912_v19 = vadd.f32 %v4908_v14, %v4896_v7  ;;  %v4897_v15 = vadd.f32 %v4893_v13, %v4889_v11 }
 0x61a   : > { %v4913_v44 = vadd.f32 %v4908_v14, %v4897_v15  ;;  %v4916_v17 = vadd.f32 %v4914_v16, %v4912_v19 }
 0x61c   : > { %v4917_v20 = vadd.f32 %v4915_v18, %v4913_v44  ;;  %4918 = vst [vmem:[%s5351_s24] sm:$0xff] %v4916_v17 }
 0x61e   : > { %4919 = vst [vmem:[%s5351_s24 + $0x8] sm:$0xff] %v4917_v20 }
 0x61f   : > { %5154 = shalt.err (!%p5151_p4)
}
 0x620   : > { %s5155_s0 = scalar_lea.hbm %s4933_s28, 256  ;;  %s5159_s15 = scalar_lea.hbm %s6406_s14, 512 }
 0x621   : > { %p5156_p7 = scmp.ne.s32.totalorder %s4933_s28, %s5155_s0  ;;  %p5160_p10 = scmp.lt.s32.totalorder %s4933_s28, %s6406_s14 }
 0x622   : > { %p5161_p11 = scmp.lt.s32.totalorder %s5159_s15, %s5155_s0 }
 0x623   : > { %p5157_p8 = pnand %p5156_p7, %p5328_p5 }
 0x624   : > { %p5162_p12 = por %p5161_p11, %p5160_p10 }
 0x625   : > { %p5158_p9 = pneg %p5157_p8 }
 0x627   : > { %p5163_p13 = pnand %p5162_p12, %p5158_p9 }
 0x629   : > { %5166 = shalt.err (!%p5163_p13)
}
 0x62a   : > { %5087 = dma.vmem_to_hbm [thread:$0]  (%p5328_p5), %s4936_s4, 256, %s4933_s28, %s4921_s22  }
 0x62b PF: > { %p5093_p0 = scmp.ge.s32.totalorder %s5201_s16, 2  ;;  %s4947_s25 = sand.u32 1, %s5189_s29  }
 0x62c   : > { %s4948_s21 = scalar_lea.sflag [#allocation4], %s4947_s25 }
 0x62d   : > { %p5090_p1 = pnand %p5093_p0, %p5332_p6 }
 0x62f   : > { %p5091_p2 = pneg %p5090_p1 }
 0x631   : > { %5184 = dma.done.wait (%p5091_p2), %s4948_s21, 256  }
 0x632   : > { %5186 = vsyncadd (%p5091_p2), %s4948_s21, 4294967040  ;;  %s6454_s16 = sld [smem:[#allocation7_spill]]  ;;  %s6457_s29 = smov %s5193_s30 }
 0x633   : > { %s6455_s27 = sld [smem:[#allocation6_spill]] }
 0x634   : > { %s6456_s15 = sld [smem:[#allocation8_spill]] }
 0x638   : > { %p24_p3 = scmp.ge.s32.totalorder %s6454_s16, 4  }
 0x639   : > { %s6458_s30 = smov %s6455_s27 }
 0x63a   :  { %26 = sbr.rel (!%p24_p3) target bundleno = 9 (0x9), region = 118 }
 0x63f   :  { %4953 = vsyncpa [#allocation4], 1 }
 0x640   :  { %4955 = vsyncpa [#allocation4 + $0x1], 1 }

</bundles_post_ra>
